<compile_context>
chip_gen: v5e
topology: v5e:2x2
jax: 0.10.0
libtpu: 0.0.40
codegen_flags: <defaults>
</compile_context>

<pallas_src>
import functools

import jax
import jax.numpy as jnp
from jax import lax
from jax.experimental import pallas as pl
from jax.experimental.pallas import tpu as pltpu


def _lstm_head_kernel(x_ref, wih_ref, whh_ref, b_ref, wfc_ref, bfc_ref,
                      out_ref, xp_ref, *, seq_len, batch_pad):
    """Whole forward pass in one invocation.

    x_ref   : (T*Bp, D)  time-major input, batch zero-padded to Bp (mxu dtype)
    wih_ref : (D, 4H)    W_ih^T   (gate order [i, f, g, o])
    whh_ref : (H, 4H)    W_hh^T
    b_ref   : (1, 4H)    b_ih + b_hh  (f32)
    wfc_ref : (H, Cp)    W_fc^T, zero-padded to lane-dense Cp
    bfc_ref : (1, Cp)    b_fc, zero-padded (f32)
    out_ref : (Bp, Cp)   logits (f32)
    xp_ref  : VMEM scratch (T*Bp, 4H) -- hoisted input projection (mxu dtype)
    """
    T = seq_len
    Bp = batch_pad
    H = whh_ref.shape[0]

    # ---- Phase 1: hoisted input projection (one big MXU matmul, bias folded,
    # f32 accumulation), stored in the (possibly bf16) scratch dtype.
    # TODO(synk): for production-scale T, chunk this over T and interleave the
    # chunk t+1 projection with the chunk t recurrence to bound VMEM (v7x).
    xp = jnp.dot(x_ref[...], wih_ref[...], preferred_element_type=jnp.float32)
    xp_ref[...] = (xp + b_ref[...]).astype(xp_ref.dtype)

    # Hoisted lane mask so ONE tanh push per step handles all four gates:
    # sigmoid(x) = 0.5*tanh(0.5*x)+0.5 for i/f/o, plain tanh for g.
    lane = lax.broadcasted_iota(jnp.int32, (1, 4 * H), 1)
    gate_scale = jnp.where((lane >= 2 * H) & (lane < 3 * H),
                           1.0, 0.5).astype(jnp.float32)

    # ---- Phase 2: serial recurrence. h/c live in vregs as fori_loop carries.
    # whh_ref deliberately NOT hoisted into a value (see header comment).
    def step(t, carry):
        h, c = carry
        row = pl.multiple_of(t * Bp, Bp)
        gates = (xp_ref[pl.ds(row, Bp), :].astype(jnp.float32)
                 + jnp.dot(h.astype(whh_ref.dtype), whh_ref[...],
                           preferred_element_type=jnp.float32))
        t_all = jnp.tanh(gates * gate_scale)          # EUP push #1: (Bp, 4H)
        i_g = 0.5 * t_all[:, 0 * H:1 * H] + 0.5
        f_g = 0.5 * t_all[:, 1 * H:2 * H] + 0.5
        g_g = t_all[:, 2 * H:3 * H]
        o_g = 0.5 * t_all[:, 3 * H:4 * H] + 0.5
        c_new = f_g * c + i_g * g_g                   # f32 VPU math (v5e-safe)
        h_new = o_g * jnp.tanh(c_new)                 # EUP push #2: (Bp, H)
        return h_new, c_new

    h0 = jnp.zeros((Bp, H), jnp.float32)
    c0 = jnp.zeros((Bp, H), jnp.float32)
    unroll = True if T <= 16 else 8                   # bounded unroll for big T
    h_T, _ = lax.fori_loop(0, T, step, (h0, c0), unroll=unroll)

    # ---- Phase 3: classifier on h_T; lane-dense (Bp, Cp) store.
    out_ref[...] = (
        jnp.dot(h_T.astype(wfc_ref.dtype), wfc_ref[...],
                preferred_element_type=jnp.float32)
        + bfc_ref[...]).astype(out_ref.dtype)


def lstm_classifier(x, w_ih, w_hh, b_ih, b_hh, w_fc, b_fc,
                    *, mxu_dtype=jnp.bfloat16):
    """x: (B, T, D).  w_ih: (4H, D), w_hh: (4H, H), b_*: (4H,),
    w_fc: (C, H), b_fc: (C,).  Returns (B, C) logits (f32).

    mxu_dtype: dtype of the matmul operands and of the hoisted projection
    scratch.  bf16 (default) is native on all MXU generations; accumulation
    and all elementwise gate math stay f32.  Pass jnp.float32 for a
    bit-faithful comparison with an f32 reference.
    """
    B, T, D = x.shape
    H = w_hh.shape[1]
    C = w_fc.shape[0]

    Bp = ((B + 7) // 8) * 8            # pad batch to a sublane multiple
    Cp = ((C + 127) // 128) * 128      # lane-dense classifier output width

    # Cast BEFORE pad/transpose so the wrapper copy and the HBM->VMEM DMA move
    # mxu_dtype bytes. Time-major (T*Bp, D) so each per-step slice is a clean
    # sublane-aligned (Bp, 4H) window inside the kernel.
    x_p = jnp.transpose(
        jnp.pad(x.astype(mxu_dtype), ((0, Bp - B), (0, 0), (0, 0))),
        (1, 0, 2)).reshape(T * Bp, D)

    wih_t = jnp.transpose(w_ih).astype(mxu_dtype)                  # (D, 4H)
    whh_t = jnp.transpose(w_hh).astype(mxu_dtype)                  # (H, 4H)
    b = (b_ih.astype(jnp.float32)
         + b_hh.astype(jnp.float32)).reshape(1, 4 * H)             # (1, 4H) f32
    wfc_t = jnp.pad(jnp.transpose(w_fc),
                    ((0, 0), (0, Cp - C))).astype(mxu_dtype)       # (H, Cp)
    bfc = jnp.pad(b_fc, (0, Cp - C)).reshape(1, Cp).astype(jnp.float32)

    isz = jnp.dtype(mxu_dtype).itemsize
    vmem_needed = (
        T * Bp * D * isz               # x_p
        + D * 4 * H * isz              # W_ih^T
        + H * 4 * H * isz              # W_hh^T
        + 4 * H * 4                    # bias
        + H * Cp * isz + Cp * 4        # classifier weights + bias
        + Bp * Cp * 4                  # output
        + T * Bp * 4 * H * isz)        # xp scratch
    vmem_limit = int(min(max(2 * vmem_needed + (4 << 20), 16 << 20), 64 << 20))

    cost = pl.CostEstimate(
        flops=2 * T * Bp * D * 4 * H          # input projection
        + 2 * T * Bp * H * 4 * H              # recurrent matmuls
        + 2 * Bp * H * Cp,                    # classifier
        transcendentals=5 * T * Bp * H,
        bytes_accessed=int(vmem_needed),
    )

    kernel = functools.partial(_lstm_head_kernel, seq_len=T, batch_pad=Bp)
    vmem = pl.BlockSpec(memory_space=pltpu.MemorySpace.VMEM)

    out = pl.pallas_call(
        kernel,
        out_shape=jax.ShapeDtypeStruct((Bp, Cp), jnp.float32),
        in_specs=[vmem] * 6,
        out_specs=vmem,
        scratch_shapes=[pltpu.VMEM((T * Bp, 4 * H), mxu_dtype)],
        compiler_params=pltpu.CompilerParams(vmem_limit_bytes=vmem_limit),
        cost_estimate=cost,
    )(x_p, wih_t, whh_t, b, wfc_t, bfc)

    return out[:B, :C]


def reference(x, w_ih, w_hh, b_ih, b_hh, w_fc, b_fc):
    B, T, D = x.shape
    H = w_hh.shape[1]
    h = jnp.zeros((B, H), jnp.float32)
    c = jnp.zeros((B, H), jnp.float32)
    for t in range(T):
        g = x[:, t, :] @ w_ih.T + h @ w_hh.T + b_ih + b_hh
        i = jax.nn.sigmoid(g[:, 0 * H:1 * H])
        f = jax.nn.sigmoid(g[:, 1 * H:2 * H])
        gg = jnp.tanh(g[:, 2 * H:3 * H])
        o = jax.nn.sigmoid(g[:, 3 * H:4 * H])
        c = f * c + i * gg
        h = o * jnp.tanh(c)
    return h @ w_fc.T + b_fc


if __name__ == "__main__":
    # Small shapes consistent with the module's forward (batch_first LSTM + head).
    B, T, D, H, C = 2, 8, 128, 128, 31

    key = jax.random.PRNGKey(0)
    ks = jax.random.split(key, 7)
    s_lstm = 1.0 / jnp.sqrt(H)
    s_fc = 1.0 / jnp.sqrt(H)

    x = jax.random.normal(ks[0], (B, T, D), jnp.float32)
    w_ih = jax.random.uniform(ks[1], (4 * H, D), jnp.float32, -s_lstm, s_lstm)
    w_hh = jax.random.uniform(ks[2], (4 * H, H), jnp.float32, -s_lstm, s_lstm)
    b_ih = jax.random.uniform(ks[3], (4 * H,), jnp.float32, -s_lstm, s_lstm)
    b_hh = jax.random.uniform(ks[4], (4 * H,), jnp.float32, -s_lstm, s_lstm)
    w_fc = jax.random.uniform(ks[5], (C, H), jnp.float32, -s_fc, s_fc)
    b_fc = jax.random.uniform(ks[6], (C,), jnp.float32, -s_fc, s_fc)

    ref = reference(x, w_ih, w_hh, b_ih, b_hh, w_fc, b_fc)

    # f32 MXU operands: tight check against the f32 reference (the only
    # intended numerical deltas are the tanh-based sigmoid and MXU f32 passes).
    out_f32 = lstm_classifier(x, w_ih, w_hh, b_ih, b_hh, w_fc, b_fc,
                              mxu_dtype=jnp.float32)
    out_f32 = jax.block_until_ready(out_f32)
    assert out_f32.shape == (B, C), out_f32.shape
    assert jnp.allclose(out_f32, ref, atol=2e-4, rtol=2e-4), \
        float(jnp.max(jnp.abs(out_f32 - ref)))

    # Default bf16 MXU-operand path (fast path on all generations): loose
    # check only, since bf16 operand/scratch rounding compounds through the
    # T-step recurrence.
    out = lstm_classifier(x, w_ih, w_hh, b_ih, b_hh, w_fc, b_fc)
    out = jax.block_until_ready(out)
    assert out.shape == (B, C)
    assert bool(jnp.all(jnp.isfinite(out)))
    assert jnp.allclose(out, ref, atol=2e-1), \
        float(jnp.max(jnp.abs(out - ref)))

    print("KERNEL_OK")
</pallas_src>

<mosaic_0001>
module attributes {stable_mosaic.version = 11 : i64} {
  func.func @_lstm_head_kernel(%arg0: memref<64x128xf32, #tpu.memory_space<vmem>>, %arg1: memref<128x512xf32, #tpu.memory_space<vmem>>, %arg2: memref<128x512xf32, #tpu.memory_space<vmem>>, %arg3: memref<1x512xf32, #tpu.memory_space<vmem>>, %arg4: memref<128x128xf32, #tpu.memory_space<vmem>>, %arg5: memref<1x128xf32, #tpu.memory_space<vmem>>, %arg6: memref<8x128xf32, #tpu.memory_space<vmem>>, %arg7: memref<64x512xf32, #tpu.memory_space<vmem>>) attributes {dimension_semantics = [], scalar_prefetch = 0 : i64, scratch_operands = 1 : i64, tpu.core_type = #tpu.core_type<tc>} {
    %c0 = arith.constant 0 : index
    %c0_0 = arith.constant 0 : index
    %0 = vector.load %arg0[%c0, %c0_0] : memref<64x128xf32, #tpu.memory_space<vmem>>, vector<64x128xf32>
    %c0_1 = arith.constant 0 : index
    %c0_2 = arith.constant 0 : index
    %1 = vector.load %arg1[%c0_1, %c0_2] : memref<128x512xf32, #tpu.memory_space<vmem>>, vector<128x512xf32>
    %cst = arith.constant dense<0.000000e+00> : vector<64x512xf32>
    %2 = tpu.matmul %0, %1, %cst {dimension_numbers = #tpu.dot_dimension_numbers<[1], [0], [0], [1], [0, 0, 1, 1], [], []>} : vector<64x128xf32>, vector<128x512xf32>, vector<64x512xf32> -> vector<64x512xf32>
    %c0_3 = arith.constant 0 : index
    %c0_4 = arith.constant 0 : index
    %3 = vector.load %arg3[%c0_3, %c0_4] : memref<1x512xf32, #tpu.memory_space<vmem>>, vector<1x512xf32>
    %4 = vector.broadcast %3 : vector<1x512xf32> to vector<64x512xf32>
    %5 = arith.addf %2, %4 : vector<64x512xf32>
    %c0_5 = arith.constant 0 : index
    %c0_6 = arith.constant 0 : index
    %6 = vector.load %arg7[%c0_5, %c0_6] : memref<64x512xf32, #tpu.memory_space<vmem>>, vector<64x512xf32>
    tpu.vector_store %arg7[%c0_5, %c0_6], %5 {strides = array<i32>} : memref<64x512xf32, #tpu.memory_space<vmem>>, vector<64x512xf32>,
    %7 = tpu.iota {dimensions = array<i32: 1>} : vector<1x512xi32>
    %c256_i32 = arith.constant 256 : i32
    %8 = vector.broadcast %c256_i32 : i32 to vector<1x512xi32>
    %9 = arith.cmpi sge, %7, %8 : vector<1x512xi32>
    %c384_i32 = arith.constant 384 : i32
    %10 = vector.broadcast %c384_i32 : i32 to vector<1x512xi32>
    %11 = arith.cmpi slt, %7, %10 : vector<1x512xi32>
    %12 = arith.andi %9, %11 : vector<1x512xi1>
    %cst_7 = arith.constant 1.000000e+00 : f32
    %cst_8 = arith.constant 5.000000e-01 : f32
    %13 = vector.broadcast %cst_7 : f32 to vector<1x512xf32>
    %14 = vector.broadcast %cst_8 : f32 to vector<1x512xf32>
    %15 = arith.select %12, %13, %14 : vector<1x512xi1>, vector<1x512xf32>
    %cst_9 = arith.constant 0.000000e+00 : f32
    %16 = vector.broadcast %cst_9 : f32 to vector<8x128xf32>
    %cst_10 = arith.constant 0.000000e+00 : f32
    %17 = vector.broadcast %cst_10 : f32 to vector<8x128xf32>
    %c0_i32 = arith.constant 0 : i32
    %c8_i32 = arith.constant 8 : i32
    %18 = arith.muli %c0_i32, %c8_i32 : i32
    %19 = tpu.assume_multiple %18, 8 : i32
    %20 = arith.index_cast %19 : i32 to index
    %c0_11 = arith.constant 0 : index
    %21 = vector.load %arg7[%20, %c0_11] : memref<64x512xf32, #tpu.memory_space<vmem>>, vector<8x512xf32>
    %c0_12 = arith.constant 0 : index
    %c0_13 = arith.constant 0 : index
    %22 = vector.load %arg2[%c0_12, %c0_13] : memref<128x512xf32, #tpu.memory_space<vmem>>, vector<128x512xf32>
    %cst_14 = arith.constant dense<0.000000e+00> : vector<8x512xf32>
    %23 = tpu.matmul %16, %22, %cst_14 {dimension_numbers = #tpu.dot_dimension_numbers<[1], [0], [0], [1], [0, 0, 1, 1], [], []>} : vector<8x128xf32>, vector<128x512xf32>, vector<8x512xf32> -> vector<8x512xf32>
    %24 = arith.addf %21, %23 : vector<8x512xf32>
    %25 = vector.broadcast %15 : vector<1x512xf32> to vector<8x512xf32>
    %26 = arith.mulf %24, %25 : vector<8x512xf32>
    %27 = math.tanh %26 : vector<8x512xf32>
    %28 = vector.extract_strided_slice %27 {offsets = [0, 0], sizes = [8, 128], strides = [1, 1]} : vector<8x512xf32> to vector<8x128xf32>
    %cst_15 = arith.constant 5.000000e-01 : f32
    %29 = vector.broadcast %cst_15 : f32 to vector<8x128xf32>
    %30 = arith.mulf %29, %28 : vector<8x128xf32>
    %cst_16 = arith.constant 5.000000e-01 : f32
    %31 = vector.broadcast %cst_16 : f32 to vector<8x128xf32>
    %32 = arith.addf %30, %31 : vector<8x128xf32>
    %33 = vector.extract_strided_slice %27 {offsets = [0, 128], sizes = [8, 128], strides = [1, 1]} : vector<8x512xf32> to vector<8x128xf32>
    %cst_17 = arith.constant 5.000000e-01 : f32
    %34 = vector.broadcast %cst_17 : f32 to vector<8x128xf32>
    %35 = arith.mulf %34, %33 : vector<8x128xf32>
    %cst_18 = arith.constant 5.000000e-01 : f32
    %36 = vector.broadcast %cst_18 : f32 to vector<8x128xf32>
    %37 = arith.addf %35, %36 : vector<8x128xf32>
    %38 = vector.extract_strided_slice %27 {offsets = [0, 256], sizes = [8, 128], strides = [1, 1]} : vector<8x512xf32> to vector<8x128xf32>
    %39 = vector.extract_strided_slice %27 {offsets = [0, 384], sizes = [8, 128], strides = [1, 1]} : vector<8x512xf32> to vector<8x128xf32>
    %cst_19 = arith.constant 5.000000e-01 : f32
    %40 = vector.broadcast %cst_19 : f32 to vector<8x128xf32>
    %41 = arith.mulf %40, %39 : vector<8x128xf32>
    %cst_20 = arith.constant 5.000000e-01 : f32
    %42 = vector.broadcast %cst_20 : f32 to vector<8x128xf32>
    %43 = arith.addf %41, %42 : vector<8x128xf32>
    %44 = arith.mulf %37, %17 : vector<8x128xf32>
    %45 = arith.mulf %32, %38 : vector<8x128xf32>
    %46 = arith.addf %44, %45 : vector<8x128xf32>
    %47 = math.tanh %46 : vector<8x128xf32>
    %48 = arith.mulf %43, %47 : vector<8x128xf32>
    %c1_i32 = arith.constant 1 : i32
    %c8_i32_21 = arith.constant 8 : i32
    %49 = arith.muli %c1_i32, %c8_i32_21 : i32
    %50 = tpu.assume_multiple %49, 8 : i32
    %51 = arith.index_cast %50 : i32 to index
    %c0_22 = arith.constant 0 : index
    %52 = vector.load %arg7[%51, %c0_22] : memref<64x512xf32, #tpu.memory_space<vmem>>, vector<8x512xf32>
    %c0_23 = arith.constant 0 : index
    %c0_24 = arith.constant 0 : index
    %53 = vector.load %arg2[%c0_23, %c0_24] : memref<128x512xf32, #tpu.memory_space<vmem>>, vector<128x512xf32>
    %cst_25 = arith.constant dense<0.000000e+00> : vector<8x512xf32>
    %54 = tpu.matmul %48, %53, %cst_25 {dimension_numbers = #tpu.dot_dimension_numbers<[1], [0], [0], [1], [0, 0, 1, 1], [], []>} : vector<8x128xf32>, vector<128x512xf32>, vector<8x512xf32> -> vector<8x512xf32>
    %55 = arith.addf %52, %54 : vector<8x512xf32>
    %56 = vector.broadcast %15 : vector<1x512xf32> to vector<8x512xf32>
    %57 = arith.mulf %55, %56 : vector<8x512xf32>
    %58 = math.tanh %57 : vector<8x512xf32>
    %59 = vector.extract_strided_slice %58 {offsets = [0, 0], sizes = [8, 128], strides = [1, 1]} : vector<8x512xf32> to vector<8x128xf32>
    %cst_26 = arith.constant 5.000000e-01 : f32
    %60 = vector.broadcast %cst_26 : f32 to vector<8x128xf32>
    %61 = arith.mulf %60, %59 : vector<8x128xf32>
    %cst_27 = arith.constant 5.000000e-01 : f32
    %62 = vector.broadcast %cst_27 : f32 to vector<8x128xf32>
    %63 = arith.addf %61, %62 : vector<8x128xf32>
    %64 = vector.extract_strided_slice %58 {offsets = [0, 128], sizes = [8, 128], strides = [1, 1]} : vector<8x512xf32> to vector<8x128xf32>
    %cst_28 = arith.constant 5.000000e-01 : f32
    %65 = vector.broadcast %cst_28 : f32 to vector<8x128xf32>
    %66 = arith.mulf %65, %64 : vector<8x128xf32>
    %cst_29 = arith.constant 5.000000e-01 : f32
    %67 = vector.broadcast %cst_29 : f32 to vector<8x128xf32>
    %68 = arith.addf %66, %67 : vector<8x128xf32>
    %69 = vector.extract_strided_slice %58 {offsets = [0, 256], sizes = [8, 128], strides = [1, 1]} : vector<8x512xf32> to vector<8x128xf32>
    %70 = vector.extract_strided_slice %58 {offsets = [0, 384], sizes = [8, 128], strides = [1, 1]} : vector<8x512xf32> to vector<8x128xf32>
    %cst_30 = arith.constant 5.000000e-01 : f32
    %71 = vector.broadcast %cst_30 : f32 to vector<8x128xf32>
    %72 = arith.mulf %71, %70 : vector<8x128xf32>
    %cst_31 = arith.constant 5.000000e-01 : f32
    %73 = vector.broadcast %cst_31 : f32 to vector<8x128xf32>
    %74 = arith.addf %72, %73 : vector<8x128xf32>
    %75 = arith.mulf %68, %46 : vector<8x128xf32>
    %76 = arith.mulf %63, %69 : vector<8x128xf32>
    %77 = arith.addf %75, %76 : vector<8x128xf32>
    %78 = math.tanh %77 : vector<8x128xf32>
    %79 = arith.mulf %74, %78 : vector<8x128xf32>
    %c2_i32 = arith.constant 2 : i32
    %c8_i32_32 = arith.constant 8 : i32
    %80 = arith.muli %c2_i32, %c8_i32_32 : i32
    %81 = tpu.assume_multiple %80, 8 : i32
    %82 = arith.index_cast %81 : i32 to index
    %c0_33 = arith.constant 0 : index
    %83 = vector.load %arg7[%82, %c0_33] : memref<64x512xf32, #tpu.memory_space<vmem>>, vector<8x512xf32>
    %c0_34 = arith.constant 0 : index
    %c0_35 = arith.constant 0 : index
    %84 = vector.load %arg2[%c0_34, %c0_35] : memref<128x512xf32, #tpu.memory_space<vmem>>, vector<128x512xf32>
    %cst_36 = arith.constant dense<0.000000e+00> : vector<8x512xf32>
    %85 = tpu.matmul %79, %84, %cst_36 {dimension_numbers = #tpu.dot_dimension_numbers<[1], [0], [0], [1], [0, 0, 1, 1], [], []>} : vector<8x128xf32>, vector<128x512xf32>, vector<8x512xf32> -> vector<8x512xf32>
    %86 = arith.addf %83, %85 : vector<8x512xf32>
    %87 = vector.broadcast %15 : vector<1x512xf32> to vector<8x512xf32>
    %88 = arith.mulf %86, %87 : vector<8x512xf32>
    %89 = math.tanh %88 : vector<8x512xf32>
    %90 = vector.extract_strided_slice %89 {offsets = [0, 0], sizes = [8, 128], strides = [1, 1]} : vector<8x512xf32> to vector<8x128xf32>
    %cst_37 = arith.constant 5.000000e-01 : f32
    %91 = vector.broadcast %cst_37 : f32 to vector<8x128xf32>
    %92 = arith.mulf %91, %90 : vector<8x128xf32>
    %cst_38 = arith.constant 5.000000e-01 : f32
    %93 = vector.broadcast %cst_38 : f32 to vector<8x128xf32>
    %94 = arith.addf %92, %93 : vector<8x128xf32>
    %95 = vector.extract_strided_slice %89 {offsets = [0, 128], sizes = [8, 128], strides = [1, 1]} : vector<8x512xf32> to vector<8x128xf32>
    %cst_39 = arith.constant 5.000000e-01 : f32
    %96 = vector.broadcast %cst_39 : f32 to vector<8x128xf32>
    %97 = arith.mulf %96, %95 : vector<8x128xf32>
    %cst_40 = arith.constant 5.000000e-01 : f32
    %98 = vector.broadcast %cst_40 : f32 to vector<8x128xf32>
    %99 = arith.addf %97, %98 : vector<8x128xf32>
    %100 = vector.extract_strided_slice %89 {offsets = [0, 256], sizes = [8, 128], strides = [1, 1]} : vector<8x512xf32> to vector<8x128xf32>
    %101 = vector.extract_strided_slice %89 {offsets = [0, 384], sizes = [8, 128], strides = [1, 1]} : vector<8x512xf32> to vector<8x128xf32>
    %cst_41 = arith.constant 5.000000e-01 : f32
    %102 = vector.broadcast %cst_41 : f32 to vector<8x128xf32>
    %103 = arith.mulf %102, %101 : vector<8x128xf32>
    %cst_42 = arith.constant 5.000000e-01 : f32
    %104 = vector.broadcast %cst_42 : f32 to vector<8x128xf32>
    %105 = arith.addf %103, %104 : vector<8x128xf32>
    %106 = arith.mulf %99, %77 : vector<8x128xf32>
    %107 = arith.mulf %94, %100 : vector<8x128xf32>
    %108 = arith.addf %106, %107 : vector<8x128xf32>
    %109 = math.tanh %108 : vector<8x128xf32>
    %110 = arith.mulf %105, %109 : vector<8x128xf32>
    %c3_i32 = arith.constant 3 : i32
    %c8_i32_43 = arith.constant 8 : i32
    %111 = arith.muli %c3_i32, %c8_i32_43 : i32
    %112 = tpu.assume_multiple %111, 8 : i32
    %113 = arith.index_cast %112 : i32 to index
    %c0_44 = arith.constant 0 : index
    %114 = vector.load %arg7[%113, %c0_44] : memref<64x512xf32, #tpu.memory_space<vmem>>, vector<8x512xf32>
    %c0_45 = arith.constant 0 : index
    %c0_46 = arith.constant 0 : index
    %115 = vector.load %arg2[%c0_45, %c0_46] : memref<128x512xf32, #tpu.memory_space<vmem>>, vector<128x512xf32>
    %cst_47 = arith.constant dense<0.000000e+00> : vector<8x512xf32>
    %116 = tpu.matmul %110, %115, %cst_47 {dimension_numbers = #tpu.dot_dimension_numbers<[1], [0], [0], [1], [0, 0, 1, 1], [], []>} : vector<8x128xf32>, vector<128x512xf32>, vector<8x512xf32> -> vector<8x512xf32>
    %117 = arith.addf %114, %116 : vector<8x512xf32>
    %118 = vector.broadcast %15 : vector<1x512xf32> to vector<8x512xf32>
    %119 = arith.mulf %117, %118 : vector<8x512xf32>
    %120 = math.tanh %119 : vector<8x512xf32>
    %121 = vector.extract_strided_slice %120 {offsets = [0, 0], sizes = [8, 128], strides = [1, 1]} : vector<8x512xf32> to vector<8x128xf32>
    %cst_48 = arith.constant 5.000000e-01 : f32
    %122 = vector.broadcast %cst_48 : f32 to vector<8x128xf32>
    %123 = arith.mulf %122, %121 : vector<8x128xf32>
    %cst_49 = arith.constant 5.000000e-01 : f32
    %124 = vector.broadcast %cst_49 : f32 to vector<8x128xf32>
    %125 = arith.addf %123, %124 : vector<8x128xf32>
    %126 = vector.extract_strided_slice %120 {offsets = [0, 128], sizes = [8, 128], strides = [1, 1]} : vector<8x512xf32> to vector<8x128xf32>
    %cst_50 = arith.constant 5.000000e-01 : f32
    %127 = vector.broadcast %cst_50 : f32 to vector<8x128xf32>
    %128 = arith.mulf %127, %126 : vector<8x128xf32>
    %cst_51 = arith.constant 5.000000e-01 : f32
    %129 = vector.broadcast %cst_51 : f32 to vector<8x128xf32>
    %130 = arith.addf %128, %129 : vector<8x128xf32>
    %131 = vector.extract_strided_slice %120 {offsets = [0, 256], sizes = [8, 128], strides = [1, 1]} : vector<8x512xf32> to vector<8x128xf32>
    %132 = vector.extract_strided_slice %120 {offsets = [0, 384], sizes = [8, 128], strides = [1, 1]} : vector<8x512xf32> to vector<8x128xf32>
    %cst_52 = arith.constant 5.000000e-01 : f32
    %133 = vector.broadcast %cst_52 : f32 to vector<8x128xf32>
    %134 = arith.mulf %133, %132 : vector<8x128xf32>
    %cst_53 = arith.constant 5.000000e-01 : f32
    %135 = vector.broadcast %cst_53 : f32 to vector<8x128xf32>
    %136 = arith.addf %134, %135 : vector<8x128xf32>
    %137 = arith.mulf %130, %108 : vector<8x128xf32>
    %138 = arith.mulf %125, %131 : vector<8x128xf32>
    %139 = arith.addf %137, %138 : vector<8x128xf32>
    %140 = math.tanh %139 : vector<8x128xf32>
    %141 = arith.mulf %136, %140 : vector<8x128xf32>
    %c4_i32 = arith.constant 4 : i32
    %c8_i32_54 = arith.constant 8 : i32
    %142 = arith.muli %c4_i32, %c8_i32_54 : i32
    %143 = tpu.assume_multiple %142, 8 : i32
    %144 = arith.index_cast %143 : i32 to index
    %c0_55 = arith.constant 0 : index
    %145 = vector.load %arg7[%144, %c0_55] : memref<64x512xf32, #tpu.memory_space<vmem>>, vector<8x512xf32>
    %c0_56 = arith.constant 0 : index
    %c0_57 = arith.constant 0 : index
    %146 = vector.load %arg2[%c0_56, %c0_57] : memref<128x512xf32, #tpu.memory_space<vmem>>, vector<128x512xf32>
    %cst_58 = arith.constant dense<0.000000e+00> : vector<8x512xf32>
    %147 = tpu.matmul %141, %146, %cst_58 {dimension_numbers = #tpu.dot_dimension_numbers<[1], [0], [0], [1], [0, 0, 1, 1], [], []>} : vector<8x128xf32>, vector<128x512xf32>, vector<8x512xf32> -> vector<8x512xf32>
    %148 = arith.addf %145, %147 : vector<8x512xf32>
    %149 = vector.broadcast %15 : vector<1x512xf32> to vector<8x512xf32>
    %150 = arith.mulf %148, %149 : vector<8x512xf32>
    %151 = math.tanh %150 : vector<8x512xf32>
    %152 = vector.extract_strided_slice %151 {offsets = [0, 0], sizes = [8, 128], strides = [1, 1]} : vector<8x512xf32> to vector<8x128xf32>
    %cst_59 = arith.constant 5.000000e-01 : f32
    %153 = vector.broadcast %cst_59 : f32 to vector<8x128xf32>
    %154 = arith.mulf %153, %152 : vector<8x128xf32>
    %cst_60 = arith.constant 5.000000e-01 : f32
    %155 = vector.broadcast %cst_60 : f32 to vector<8x128xf32>
    %156 = arith.addf %154, %155 : vector<8x128xf32>
    %157 = vector.extract_strided_slice %151 {offsets = [0, 128], sizes = [8, 128], strides = [1, 1]} : vector<8x512xf32> to vector<8x128xf32>
    %cst_61 = arith.constant 5.000000e-01 : f32
    %158 = vector.broadcast %cst_61 : f32 to vector<8x128xf32>
    %159 = arith.mulf %158, %157 : vector<8x128xf32>
    %cst_62 = arith.constant 5.000000e-01 : f32
    %160 = vector.broadcast %cst_62 : f32 to vector<8x128xf32>
    %161 = arith.addf %159, %160 : vector<8x128xf32>
    %162 = vector.extract_strided_slice %151 {offsets = [0, 256], sizes = [8, 128], strides = [1, 1]} : vector<8x512xf32> to vector<8x128xf32>
    %163 = vector.extract_strided_slice %151 {offsets = [0, 384], sizes = [8, 128], strides = [1, 1]} : vector<8x512xf32> to vector<8x128xf32>
    %cst_63 = arith.constant 5.000000e-01 : f32
    %164 = vector.broadcast %cst_63 : f32 to vector<8x128xf32>
    %165 = arith.mulf %164, %163 : vector<8x128xf32>
    %cst_64 = arith.constant 5.000000e-01 : f32
    %166 = vector.broadcast %cst_64 : f32 to vector<8x128xf32>
    %167 = arith.addf %165, %166 : vector<8x128xf32>
    %168 = arith.mulf %161, %139 : vector<8x128xf32>
    %169 = arith.mulf %156, %162 : vector<8x128xf32>
    %170 = arith.addf %168, %169 : vector<8x128xf32>
    %171 = math.tanh %170 : vector<8x128xf32>
    %172 = arith.mulf %167, %171 : vector<8x128xf32>
    %c5_i32 = arith.constant 5 : i32
    %c8_i32_65 = arith.constant 8 : i32
    %173 = arith.muli %c5_i32, %c8_i32_65 : i32
    %174 = tpu.assume_multiple %173, 8 : i32
    %175 = arith.index_cast %174 : i32 to index
    %c0_66 = arith.constant 0 : index
    %176 = vector.load %arg7[%175, %c0_66] : memref<64x512xf32, #tpu.memory_space<vmem>>, vector<8x512xf32>
    %c0_67 = arith.constant 0 : index
    %c0_68 = arith.constant 0 : index
    %177 = vector.load %arg2[%c0_67, %c0_68] : memref<128x512xf32, #tpu.memory_space<vmem>>, vector<128x512xf32>
    %cst_69 = arith.constant dense<0.000000e+00> : vector<8x512xf32>
    %178 = tpu.matmul %172, %177, %cst_69 {dimension_numbers = #tpu.dot_dimension_numbers<[1], [0], [0], [1], [0, 0, 1, 1], [], []>} : vector<8x128xf32>, vector<128x512xf32>, vector<8x512xf32> -> vector<8x512xf32>
    %179 = arith.addf %176, %178 : vector<8x512xf32>
    %180 = vector.broadcast %15 : vector<1x512xf32> to vector<8x512xf32>
    %181 = arith.mulf %179, %180 : vector<8x512xf32>
    %182 = math.tanh %181 : vector<8x512xf32>
    %183 = vector.extract_strided_slice %182 {offsets = [0, 0], sizes = [8, 128], strides = [1, 1]} : vector<8x512xf32> to vector<8x128xf32>
    %cst_70 = arith.constant 5.000000e-01 : f32
    %184 = vector.broadcast %cst_70 : f32 to vector<8x128xf32>
    %185 = arith.mulf %184, %183 : vector<8x128xf32>
    %cst_71 = arith.constant 5.000000e-01 : f32
    %186 = vector.broadcast %cst_71 : f32 to vector<8x128xf32>
    %187 = arith.addf %185, %186 : vector<8x128xf32>
    %188 = vector.extract_strided_slice %182 {offsets = [0, 128], sizes = [8, 128], strides = [1, 1]} : vector<8x512xf32> to vector<8x128xf32>
    %cst_72 = arith.constant 5.000000e-01 : f32
    %189 = vector.broadcast %cst_72 : f32 to vector<8x128xf32>
    %190 = arith.mulf %189, %188 : vector<8x128xf32>
    %cst_73 = arith.constant 5.000000e-01 : f32
    %191 = vector.broadcast %cst_73 : f32 to vector<8x128xf32>
    %192 = arith.addf %190, %191 : vector<8x128xf32>
    %193 = vector.extract_strided_slice %182 {offsets = [0, 256], sizes = [8, 128], strides = [1, 1]} : vector<8x512xf32> to vector<8x128xf32>
    %194 = vector.extract_strided_slice %182 {offsets = [0, 384], sizes = [8, 128], strides = [1, 1]} : vector<8x512xf32> to vector<8x128xf32>
    %cst_74 = arith.constant 5.000000e-01 : f32
    %195 = vector.broadcast %cst_74 : f32 to vector<8x128xf32>
    %196 = arith.mulf %195, %194 : vector<8x128xf32>
    %cst_75 = arith.constant 5.000000e-01 : f32
    %197 = vector.broadcast %cst_75 : f32 to vector<8x128xf32>
    %198 = arith.addf %196, %197 : vector<8x128xf32>
    %199 = arith.mulf %192, %170 : vector<8x128xf32>
    %200 = arith.mulf %187, %193 : vector<8x128xf32>
    %201 = arith.addf %199, %200 : vector<8x128xf32>
    %202 = math.tanh %201 : vector<8x128xf32>
    %203 = arith.mulf %198, %202 : vector<8x128xf32>
    %c6_i32 = arith.constant 6 : i32
    %c8_i32_76 = arith.constant 8 : i32
    %204 = arith.muli %c6_i32, %c8_i32_76 : i32
    %205 = tpu.assume_multiple %204, 8 : i32
    %206 = arith.index_cast %205 : i32 to index
    %c0_77 = arith.constant 0 : index
    %207 = vector.load %arg7[%206, %c0_77] : memref<64x512xf32, #tpu.memory_space<vmem>>, vector<8x512xf32>
    %c0_78 = arith.constant 0 : index
    %c0_79 = arith.constant 0 : index
    %208 = vector.load %arg2[%c0_78, %c0_79] : memref<128x512xf32, #tpu.memory_space<vmem>>, vector<128x512xf32>
    %cst_80 = arith.constant dense<0.000000e+00> : vector<8x512xf32>
    %209 = tpu.matmul %203, %208, %cst_80 {dimension_numbers = #tpu.dot_dimension_numbers<[1], [0], [0], [1], [0, 0, 1, 1], [], []>} : vector<8x128xf32>, vector<128x512xf32>, vector<8x512xf32> -> vector<8x512xf32>
    %210 = arith.addf %207, %209 : vector<8x512xf32>
    %211 = vector.broadcast %15 : vector<1x512xf32> to vector<8x512xf32>
    %212 = arith.mulf %210, %211 : vector<8x512xf32>
    %213 = math.tanh %212 : vector<8x512xf32>
    %214 = vector.extract_strided_slice %213 {offsets = [0, 0], sizes = [8, 128], strides = [1, 1]} : vector<8x512xf32> to vector<8x128xf32>
    %cst_81 = arith.constant 5.000000e-01 : f32
    %215 = vector.broadcast %cst_81 : f32 to vector<8x128xf32>
    %216 = arith.mulf %215, %214 : vector<8x128xf32>
    %cst_82 = arith.constant 5.000000e-01 : f32
    %217 = vector.broadcast %cst_82 : f32 to vector<8x128xf32>
    %218 = arith.addf %216, %217 : vector<8x128xf32>
    %219 = vector.extract_strided_slice %213 {offsets = [0, 128], sizes = [8, 128], strides = [1, 1]} : vector<8x512xf32> to vector<8x128xf32>
    %cst_83 = arith.constant 5.000000e-01 : f32
    %220 = vector.broadcast %cst_83 : f32 to vector<8x128xf32>
    %221 = arith.mulf %220, %219 : vector<8x128xf32>
    %cst_84 = arith.constant 5.000000e-01 : f32
    %222 = vector.broadcast %cst_84 : f32 to vector<8x128xf32>
    %223 = arith.addf %221, %222 : vector<8x128xf32>
    %224 = vector.extract_strided_slice %213 {offsets = [0, 256], sizes = [8, 128], strides = [1, 1]} : vector<8x512xf32> to vector<8x128xf32>
    %225 = vector.extract_strided_slice %213 {offsets = [0, 384], sizes = [8, 128], strides = [1, 1]} : vector<8x512xf32> to vector<8x128xf32>
    %cst_85 = arith.constant 5.000000e-01 : f32
    %226 = vector.broadcast %cst_85 : f32 to vector<8x128xf32>
    %227 = arith.mulf %226, %225 : vector<8x128xf32>
    %cst_86 = arith.constant 5.000000e-01 : f32
    %228 = vector.broadcast %cst_86 : f32 to vector<8x128xf32>
    %229 = arith.addf %227, %228 : vector<8x128xf32>
    %230 = arith.mulf %223, %201 : vector<8x128xf32>
    %231 = arith.mulf %218, %224 : vector<8x128xf32>
    %232 = arith.addf %230, %231 : vector<8x128xf32>
    %233 = math.tanh %232 : vector<8x128xf32>
    %234 = arith.mulf %229, %233 : vector<8x128xf32>
    %c7_i32 = arith.constant 7 : i32
    %c8_i32_87 = arith.constant 8 : i32
    %235 = arith.muli %c7_i32, %c8_i32_87 : i32
    %236 = tpu.assume_multiple %235, 8 : i32
    %237 = arith.index_cast %236 : i32 to index
    %c0_88 = arith.constant 0 : index
    %238 = vector.load %arg7[%237, %c0_88] : memref<64x512xf32, #tpu.memory_space<vmem>>, vector<8x512xf32>
    %c0_89 = arith.constant 0 : index
    %c0_90 = arith.constant 0 : index
    %239 = vector.load %arg2[%c0_89, %c0_90] : memref<128x512xf32, #tpu.memory_space<vmem>>, vector<128x512xf32>
    %cst_91 = arith.constant dense<0.000000e+00> : vector<8x512xf32>
    %240 = tpu.matmul %234, %239, %cst_91 {dimension_numbers = #tpu.dot_dimension_numbers<[1], [0], [0], [1], [0, 0, 1, 1], [], []>} : vector<8x128xf32>, vector<128x512xf32>, vector<8x512xf32> -> vector<8x512xf32>
    %241 = arith.addf %238, %240 : vector<8x512xf32>
    %242 = vector.broadcast %15 : vector<1x512xf32> to vector<8x512xf32>
    %243 = arith.mulf %241, %242 : vector<8x512xf32>
    %244 = math.tanh %243 : vector<8x512xf32>
    %245 = vector.extract_strided_slice %244 {offsets = [0, 0], sizes = [8, 128], strides = [1, 1]} : vector<8x512xf32> to vector<8x128xf32>
    %cst_92 = arith.constant 5.000000e-01 : f32
    %246 = vector.broadcast %cst_92 : f32 to vector<8x128xf32>
    %247 = arith.mulf %246, %245 : vector<8x128xf32>
    %cst_93 = arith.constant 5.000000e-01 : f32
    %248 = vector.broadcast %cst_93 : f32 to vector<8x128xf32>
    %249 = arith.addf %247, %248 : vector<8x128xf32>
    %250 = vector.extract_strided_slice %244 {offsets = [0, 128], sizes = [8, 128], strides = [1, 1]} : vector<8x512xf32> to vector<8x128xf32>
    %cst_94 = arith.constant 5.000000e-01 : f32
    %251 = vector.broadcast %cst_94 : f32 to vector<8x128xf32>
    %252 = arith.mulf %251, %250 : vector<8x128xf32>
    %cst_95 = arith.constant 5.000000e-01 : f32
    %253 = vector.broadcast %cst_95 : f32 to vector<8x128xf32>
    %254 = arith.addf %252, %253 : vector<8x128xf32>
    %255 = vector.extract_strided_slice %244 {offsets = [0, 256], sizes = [8, 128], strides = [1, 1]} : vector<8x512xf32> to vector<8x128xf32>
    %256 = vector.extract_strided_slice %244 {offsets = [0, 384], sizes = [8, 128], strides = [1, 1]} : vector<8x512xf32> to vector<8x128xf32>
    %cst_96 = arith.constant 5.000000e-01 : f32
    %257 = vector.broadcast %cst_96 : f32 to vector<8x128xf32>
    %258 = arith.mulf %257, %256 : vector<8x128xf32>
    %cst_97 = arith.constant 5.000000e-01 : f32
    %259 = vector.broadcast %cst_97 : f32 to vector<8x128xf32>
    %260 = arith.addf %258, %259 : vector<8x128xf32>
    %261 = arith.mulf %254, %232 : vector<8x128xf32>
    %262 = arith.mulf %249, %255 : vector<8x128xf32>
    %263 = arith.addf %261, %262 : vector<8x128xf32>
    %264 = math.tanh %263 : vector<8x128xf32>
    %265 = arith.mulf %260, %264 : vector<8x128xf32>
    %c8_i32_98 = arith.constant 8 : i32
    %c0_99 = arith.constant 0 : index
    %c0_100 = arith.constant 0 : index
    %266 = vector.load %arg4[%c0_99, %c0_100] : memref<128x128xf32, #tpu.memory_space<vmem>>, vector<128x128xf32>
    %cst_101 = arith.constant dense<0.000000e+00> : vector<8x128xf32>
    %267 = tpu.matmul %265, %266, %cst_101 {dimension_numbers = #tpu.dot_dimension_numbers<[1], [0], [0], [1], [0, 0, 1, 1], [], []>} : vector<8x128xf32>, vector<128x128xf32>, vector<8x128xf32> -> vector<8x128xf32>
    %c0_102 = arith.constant 0 : index
    %c0_103 = arith.constant 0 : index
    %268 = vector.load %arg5[%c0_102, %c0_103] : memref<1x128xf32, #tpu.memory_space<vmem>>, vector<1x128xf32>
    %269 = vector.broadcast %268 : vector<1x128xf32> to vector<8x128xf32>
    %270 = arith.addf %267, %269 : vector<8x128xf32>
    %c0_104 = arith.constant 0 : index
    %c0_105 = arith.constant 0 : index
    %271 = vector.load %arg6[%c0_104, %c0_105] : memref<8x128xf32, #tpu.memory_space<vmem>>, vector<8x128xf32>
    tpu.vector_store %arg6[%c0_104, %c0_105], %270 {strides = array<i32>} : memref<8x128xf32, #tpu.memory_space<vmem>>, vector<8x128xf32>,
    return
  }
}

</mosaic_0001>

<bundles_post_ra>
// kernel: tpu_custom_call.1
= control target key start
LH: loop header
LB: loop body
LE: loop exit
PB: predicated region body
PF: predicated region fallthrough
CT: control target
= control target key end

     0   :  { %11 = vsyncpa [#allocation4], 0  ;;  %s2683_s0 = inlined_call_operand.hbm [shape: f32[64,128], index: 0, kind: input, shape index: {}]   ;;  %s2684_s1 = inlined_call_operand.hbm [shape: f32[128,512], index: 1, kind: input, shape index: {}]   ;;  %s2685_s2 = inlined_call_operand.hbm [shape: f32[128,512], index: 2, kind: input, shape index: {}]   ;;  %s2686_s3 = inlined_call_operand.hbm [shape: f32[1,512], index: 3, kind: input, shape index: {}]   ;;  %s2687_s4 = inlined_call_operand.hbm [shape: f32[128,128], index: 4, kind: input, shape index: {}]   ;;  %s2688_s5 = inlined_call_operand.vmem [shape: f32[1,128], index: 5, kind: input, shape index: {}]   ;;  %s2689_s6 = inlined_call_operand.hbm [shape: f32[8,128], index: 6, kind: output, shape index: {}]  }
   0x1   :  { %12 = vsyncpa [#allocation7], 0 }
   0x2   :  { %13 = vsyncpa [#allocation10], 0  ;;  %s32_s23 = sshll.u32 %s2684_s1, 4  ;;  %s33_s23 = int_to_ptr.hbm [resolvable:$true] %s32_s23 }
   0x3   :  { %14 = vsyncpa [#allocation5], 0  ;;  %s1718_s24 = smov [#allocation6]   ;;  %s59_s28 = sshll.u32 %s2686_s3, 4  ;;  %s60_s28 = int_to_ptr.hbm [resolvable:$true] %s59_s28 }
   0x4   :  { %s34_s25 = sshll.u32 %s1718_s24, 4  ;;  %s1719_s29 = smov 512   ;;  %s35_s25 = int_to_ptr.vmem [resolvable:$true] %s34_s25 }
   0x5   :  { %s1720_s30 = smov 32   ;;  %s1721_s7 = smov [#allocation9]  }
   0x6   :  { %40 = dma.hbm_to_vmem [thread:$0]  %s33_s23, 8192, %s35_s25, [#allocation7], %s1719_s29, %s1719_s29, %s1720_s30  }
   0x7   :  { %s61_s8 = sshll.u32 %s1721_s7, 4  ;;  %s19_s11 = sshll.u32 %s2683_s0, 4  ;;  %s62_s8 = int_to_ptr.vmem [resolvable:$true] %s61_s8  ;;  %s20_s11 = int_to_ptr.hbm [resolvable:$true] %s19_s11 }
   0x8   :  { %64 = dma.hbm_to_vmem [thread:$0]  %s60_s28, 64, %s62_s8, [#allocation10]  }
   0x9   :  { %s1722_s1 = smov [#allocation3]   ;;  %s45_s3 = sshll.u32 %s2685_s2, 4  ;;  %s46_s3 = int_to_ptr.hbm [resolvable:$true] %s45_s3 }
   0xa   :  { %s21_s12 = sshll.u32 %s1722_s1, 4  ;;  %s1723_s15 = smov 128   ;;  %s22_s12 = int_to_ptr.vmem [resolvable:$true] %s21_s12 }
   0xb   :  { %s1724_s16 = smov 8   ;;  %s1725_s17 = smov [#allocation8]  }
   0xc   :  { %27 = dma.hbm_to_vmem [thread:$0]  %s20_s11, 1024, %s22_s12, [#allocation4], %s1723_s15, %s1723_s15, %s1724_s16  }
   0xd   :  { %s47_s18 = sshll.u32 %s1725_s17, 4  ;;  %s69_s0 = sshll.u32 %s2687_s4, 4  ;;  %s48_s18 = int_to_ptr.vmem [resolvable:$true] %s47_s18  ;;  %s70_s0 = int_to_ptr.hbm [resolvable:$true] %s69_s0 }
   0xe   :  { %53 = dma.hbm_to_vmem [thread:$0]  %s46_s3, 8192, %s48_s18, [#allocation7], %s1719_s29, %s1719_s29, %s1720_s30  }
   0xf   :  { %s1726_s21 = smov [#allocation11]  }
  0x10   :  { %s71_s22 = sshll.u32 %s1726_s21, 4  ;;  %s72_s22 = int_to_ptr.vmem [resolvable:$true] %s71_s22 }
  0x11   :  { %77 = dma.hbm_to_vmem [thread:$0]  %s70_s0, 2048, %s72_s22, [#allocation10], %s1723_s15, %s1723_s15, %s1724_s16  }
  0x12   :  { %1710 = dma.done.wait [#allocation4], 1024  }
  0x13   :  { %1711 = vsyncadd [#allocation4], 4294966272 }
  0x14   :  { %1712 = dma.done.wait [#allocation7], 16384  }
  0x15   :  { %1713 = vsyncadd [#allocation7], 4294950912 }
  0x16   :  { %1714 = dma.done.wait [#allocation10], 2112  }
  0x17   :  { %1715 = vsyncadd [#allocation10], 4294965184  ;;  %v168_v0 = vld [vmem:[#allocation6 + $0x1e0] sm:$0xff]  ;;  %v169_v1 = vld [vmem:[#allocation6 + $0x1e8] sm:$0xff]  ;;  %s1728_s23 = smov [#allocation12]   ;;  %s1391_s27 = sshll.u32 %s2689_s6, 4  ;;  %s1392_s27 = int_to_ptr.hbm [resolvable:$true] %s1391_s27 }
  0x18   :  { %v170_v2 = vld [vmem:[#allocation6 + $0x1f0] sm:$0xff]  ;;  %182 = vmatpush.msra.mxu0 %v168_v0  ;;  %223 = vmatpush.msra.mxu1 %v169_v1  ;;  %v171_v3 = vld [vmem:[#allocation6 + $0x1f8] sm:$0xff]  ;;  %v164_v4 = vld [vmem:[#allocation6 + $0x1c0] sm:$0xff]  ;;  %s1389_s24 = sshll.u32 %s1728_s23, 4  ;;  %s1390_s24 = int_to_ptr.vmem [resolvable:$true] %s1389_s24 }
  0x19   :  { %v165_v5 = vld [vmem:[#allocation6 + $0x1c8] sm:$0xff]  ;;  %264 = vmatpush.msra.mxu2 %v170_v2  ;;  %305 = vmatpush.msra.mxu3 %v171_v3  ;;  %v166_v6 = vld [vmem:[#allocation6 + $0x1d0] sm:$0xff]  ;;  %v167_v7 = vld [vmem:[#allocation6 + $0x1d8] sm:$0xff] }
  0x1a   :  { %v160_v8 = vld [vmem:[#allocation6 + $0x1a0] sm:$0xff]  ;;  %183 = vmatpush.msra.mxu0 %v164_v4  ;;  %224 = vmatpush.msra.mxu1 %v165_v5  ;;  %v161_v9 = vld [vmem:[#allocation6 + $0x1a8] sm:$0xff]  ;;  %v162_v10 = vld [vmem:[#allocation6 + $0x1b0] sm:$0xff] }
  0x1b   :  { %v163_v11 = vld [vmem:[#allocation6 + $0x1b8] sm:$0xff]  ;;  %265 = vmatpush.msra.mxu2 %v166_v6  ;;  %306 = vmatpush.msra.mxu3 %v167_v7  ;;  %v156_v12 = vld [vmem:[#allocation6 + $0x180] sm:$0xff]  ;;  %v157_v13 = vld [vmem:[#allocation6 + $0x188] sm:$0xff] }
  0x1c   :  { %184 = vmatpush.msra.mxu0 %v160_v8  ;;  %225 = vmatpush.msra.mxu1 %v161_v9  ;;  %v158_v14 = vld [vmem:[#allocation6 + $0x190] sm:$0xff]  ;;  %v159_v15 = vld [vmem:[#allocation6 + $0x198] sm:$0xff]  ;;  %v152_v16 = vld [vmem:[#allocation6 + $0x160] sm:$0xff] }
  0x1d   :  { %266 = vmatpush.msra.mxu2 %v162_v10  ;;  %307 = vmatpush.msra.mxu3 %v163_v11  ;;  %v153_v17 = vld [vmem:[#allocation6 + $0x168] sm:$0xff]  ;;  %v154_v18 = vld [vmem:[#allocation6 + $0x170] sm:$0xff]  ;;  %v155_v19 = vld [vmem:[#allocation6 + $0x178] sm:$0xff] }
  0x1e   :  { %185 = vmatpush.msra.mxu0 %v156_v12  ;;  %226 = vmatpush.msra.mxu1 %v157_v13  ;;  %v148_v20 = vld [vmem:[#allocation6 + $0x140] sm:$0xff]  ;;  %v149_v21 = vld [vmem:[#allocation6 + $0x148] sm:$0xff]  ;;  %v150_v22 = vld [vmem:[#allocation6 + $0x150] sm:$0xff] }
  0x1f   :  { %267 = vmatpush.msra.mxu2 %v158_v14  ;;  %308 = vmatpush.msra.mxu3 %v159_v15  ;;  %v151_v23 = vld [vmem:[#allocation6 + $0x158] sm:$0xff]  ;;  %v144_v24 = vld [vmem:[#allocation6 + $0x120] sm:$0xff]  ;;  %v145_v25 = vld [vmem:[#allocation6 + $0x128] sm:$0xff] }
  0x20   :  { %186 = vmatpush.msra.mxu0 %v152_v16  ;;  %227 = vmatpush.msra.mxu1 %v153_v17  ;;  %v146_v26 = vld [vmem:[#allocation6 + $0x130] sm:$0xff]  ;;  %v147_v27 = vld [vmem:[#allocation6 + $0x138] sm:$0xff]  ;;  %v140_v28 = vld [vmem:[#allocation6 + $0x100] sm:$0xff] }
  0x21   :  { %268 = vmatpush.msra.mxu2 %v154_v18  ;;  %309 = vmatpush.msra.mxu3 %v155_v19  ;;  %v141_v29 = vld [vmem:[#allocation6 + $0x108] sm:$0xff]  ;;  %v142_v30 = vld [vmem:[#allocation6 + $0x110] sm:$0xff]  ;;  %v143_v31 = vld [vmem:[#allocation6 + $0x118] sm:$0xff] }
  0x22   :  { %187 = vmatpush.msra.mxu0 %v148_v20  ;;  %228 = vmatpush.msra.mxu1 %v149_v21  ;;  %v136_v32 = vld [vmem:[#allocation6 + $0xe0] sm:$0xff]  ;;  %v137_v33 = vld [vmem:[#allocation6 + $0xe8] sm:$0xff]  ;;  %v138_v34 = vld [vmem:[#allocation6 + $0xf0] sm:$0xff] }
  0x23   :  { %269 = vmatpush.msra.mxu2 %v150_v22  ;;  %310 = vmatpush.msra.mxu3 %v151_v23  ;;  %v139_v35 = vld [vmem:[#allocation6 + $0xf8] sm:$0xff]  ;;  %v132_v36 = vld [vmem:[#allocation6 + $0xc0] sm:$0xff]  ;;  %v133_v37 = vld [vmem:[#allocation6 + $0xc8] sm:$0xff] }
  0x24   :  { %188 = vmatpush.msra.mxu0 %v144_v24  ;;  %229 = vmatpush.msra.mxu1 %v145_v25  ;;  %v134_v38 = vld [vmem:[#allocation6 + $0xd0] sm:$0xff]  ;;  %v135_v39 = vld [vmem:[#allocation6 + $0xd8] sm:$0xff]  ;;  %v128_v40 = vld [vmem:[#allocation6 + $0xa0] sm:$0xff] }
  0x25   :  { %270 = vmatpush.msra.mxu2 %v146_v26  ;;  %311 = vmatpush.msra.mxu3 %v147_v27  ;;  %v129_v41 = vld [vmem:[#allocation6 + $0xa8] sm:$0xff]  ;;  %v130_v42 = vld [vmem:[#allocation6 + $0xb0] sm:$0xff]  ;;  %v131_v43 = vld [vmem:[#allocation6 + $0xb8] sm:$0xff] }
  0x26   :  { %189 = vmatpush.msra.mxu0 %v140_v28  ;;  %230 = vmatpush.msra.mxu1 %v141_v29  ;;  %v124_v44 = vld [vmem:[#allocation6 + $0x80] sm:$0xff]  ;;  %v125_v45 = vld [vmem:[#allocation6 + $0x88] sm:$0xff]  ;;  %v126_v46 = vld [vmem:[#allocation6 + $0x90] sm:$0xff] }
  0x27   :  { %271 = vmatpush.msra.mxu2 %v142_v30  ;;  %312 = vmatpush.msra.mxu3 %v143_v31  ;;  %v127_v47 = vld [vmem:[#allocation6 + $0x98] sm:$0xff]  ;;  %v120_v48 = vld [vmem:[#allocation6 + $0x60] sm:$0xff]  ;;  %v121_v49 = vld [vmem:[#allocation6 + $0x68] sm:$0xff] }
  0x28   :  { %190 = vmatpush.msra.mxu0 %v136_v32  ;;  %231 = vmatpush.msra.mxu1 %v137_v33  ;;  %v122_v50 = vld [vmem:[#allocation6 + $0x70] sm:$0xff]  ;;  %v123_v51 = vld [vmem:[#allocation6 + $0x78] sm:$0xff]  ;;  %v116_v52 = vld [vmem:[#allocation6 + $0x40] sm:$0xff] }
  0x29   :  { %272 = vmatpush.msra.mxu2 %v138_v34  ;;  %313 = vmatpush.msra.mxu3 %v139_v35  ;;  %v117_v53 = vld [vmem:[#allocation6 + $0x48] sm:$0xff]  ;;  %v118_v54 = vld [vmem:[#allocation6 + $0x50] sm:$0xff]  ;;  %v119_v55 = vld [vmem:[#allocation6 + $0x58] sm:$0xff] }
  0x2a   :  { %191 = vmatpush.msra.mxu0 %v132_v36  ;;  %232 = vmatpush.msra.mxu1 %v133_v37  ;;  %v112_v56 = vld [vmem:[#allocation6 + $0x20] sm:$0xff]  ;;  %v113_v57 = vld [vmem:[#allocation6 + $0x28] sm:$0xff]  ;;  %v114_v58 = vld [vmem:[#allocation6 + $0x30] sm:$0xff] }
  0x2b   :  { %273 = vmatpush.msra.mxu2 %v134_v38  ;;  %314 = vmatpush.msra.mxu3 %v135_v39  ;;  %v115_v59 = vld [vmem:[#allocation6 + $0x38] sm:$0xff]  ;;  %v108_v60 = vld [vmem:[#allocation6] sm:$0xff]  ;;  %v109_v61 = vld [vmem:[#allocation6 + $0x8] sm:$0xff] }
  0x2c   :  { %192 = vmatpush.msra.mxu0 %v128_v40  ;;  %233 = vmatpush.msra.mxu1 %v129_v41  ;;  %v110_v62 = vld [vmem:[#allocation6 + $0x10] sm:$0xff]  ;;  %v111_v63 = vld [vmem:[#allocation6 + $0x18] sm:$0xff]  ;;  %v100_v0 = vld [vmem:[#allocation3] sm:$0xff] }
  0x2d   :  { %274 = vmatpush.msra.mxu2 %v130_v42  ;;  %315 = vmatpush.msra.mxu3 %v131_v43  ;;  %v1779_v1 = vld [vmem:[#allocation8 + $0x1e0] sm:$0xff]  ;;  %v1781_v2 = vld [vmem:[#allocation8 + $0x1e8] sm:$0xff]  ;;  %v1783_v3 = vld [vmem:[#allocation8 + $0x1f0] sm:$0xff] }
  0x2e   :  { %193 = vmatpush.msra.mxu0 %v124_v44  ;;  %234 = vmatpush.msra.mxu1 %v125_v45  ;;  %v1785_v4 = vld [vmem:[#allocation8 + $0x1f8] sm:$0xff]  ;;  %v1787_v5 = vld [vmem:[#allocation8 + $0x1c0] sm:$0xff]  ;;  %v1789_v6 = vld [vmem:[#allocation8 + $0x1c8] sm:$0xff] }
  0x2f   :  { %275 = vmatpush.msra.mxu2 %v126_v46  ;;  %316 = vmatpush.msra.mxu3 %v127_v47  ;;  %v1793_v7 = vld [vmem:[#allocation8 + $0x1d0] sm:$0xff]  ;;  %v1795_v8 = vld [vmem:[#allocation8 + $0x1d8] sm:$0xff]  ;;  %v1799_v9 = vld [vmem:[#allocation8 + $0x1a0] sm:$0xff] }
  0x30   :  { %194 = vmatpush.msra.mxu0 %v120_v48  ;;  %235 = vmatpush.msra.mxu1 %v121_v49  ;;  %v1801_v10 = vld [vmem:[#allocation8 + $0x1a8] sm:$0xff]  ;;  %v1805_v11 = vld [vmem:[#allocation8 + $0x1b0] sm:$0xff]  ;;  %v1807_v12 = vld [vmem:[#allocation8 + $0x1b8] sm:$0xff] }
  0x31   :  { %276 = vmatpush.msra.mxu2 %v122_v50  ;;  %317 = vmatpush.msra.mxu3 %v123_v51  ;;  %v101_v13 = vld [vmem:[#allocation3 + $0x8] sm:$0xff]  ;;  %v1814_v14 = vld [vmem:[#allocation8 + $0x180] sm:$0xff]  ;;  %v1819_v16 = vld [vmem:[#allocation8 + $0x190] sm:$0xff] }
  0x32   :  { %195 = vmatpush.msra.mxu0 %v116_v52  ;;  %236 = vmatpush.msra.mxu1 %v117_v53  ;;  %v1816_v15 = vld [vmem:[#allocation8 + $0x188] sm:$0xff]  ;;  %v1821_v17 = vld [vmem:[#allocation8 + $0x198] sm:$0xff]  ;;  %v1823_v18 = vld [vmem:[#allocation8 + $0x160] sm:$0xff] }
  0x33   :  { %277 = vmatpush.msra.mxu2 %v118_v54  ;;  %318 = vmatpush.msra.mxu3 %v119_v55  ;;  %v1825_v19 = vld [vmem:[#allocation8 + $0x168] sm:$0xff]  ;;  %v1829_v20 = vld [vmem:[#allocation8 + $0x170] sm:$0xff]  ;;  %v1831_v21 = vld [vmem:[#allocation8 + $0x178] sm:$0xff] }
  0x34   :  { %196 = vmatpush.msra.mxu0 %v112_v56  ;;  %237 = vmatpush.msra.mxu1 %v113_v57  ;;  %v1835_v22 = vld [vmem:[#allocation8 + $0x140] sm:$0xff]  ;;  %v1837_v23 = vld [vmem:[#allocation8 + $0x148] sm:$0xff]  ;;  %v1841_v24 = vld [vmem:[#allocation8 + $0x150] sm:$0xff] }
  0x35   :  { %278 = vmatpush.msra.mxu2 %v114_v58  ;;  %319 = vmatpush.msra.mxu3 %v115_v59  ;;  %v1843_v25 = vld [vmem:[#allocation8 + $0x158] sm:$0xff]  ;;  %v102_v26 = vld [vmem:[#allocation3 + $0x10] sm:$0xff]  ;;  %v1850_v27 = vld [vmem:[#allocation8 + $0x120] sm:$0xff] }
  0x36   :  { %197 = vmatpush.msra.mxu0 %v108_v60  ;;  %238 = vmatpush.msra.mxu1 %v109_v61  ;;  %v1852_v28 = vld [vmem:[#allocation8 + $0x128] sm:$0xff]  ;;  %v1855_v29 = vld [vmem:[#allocation8 + $0x130] sm:$0xff]  ;;  %v1857_v30 = vld [vmem:[#allocation8 + $0x138] sm:$0xff] }
  0x37   :  { %279 = vmatpush.msra.mxu2 %v110_v62  ;;  %320 = vmatpush.msra.mxu3 %v111_v63  ;;  %v1859_v31 = vld [vmem:[#allocation8 + $0x100] sm:$0xff]  ;;  %v1861_v32 = vld [vmem:[#allocation8 + $0x108] sm:$0xff]  ;;  %v1865_v33 = vld [vmem:[#allocation8 + $0x110] sm:$0xff] }
  0x38   :  { %198 = vmatmul.f32.vlgmr.msra.gmra.mxu0 %v100_v0  ;;  %239 = vmatmul.f32.vlgmr.msra.gmra.mxu1 %v100_v0  ;;  %v1867_v34 = vld [vmem:[#allocation8 + $0x118] sm:$0xff]  ;;  %v1871_v35 = vld [vmem:[#allocation8 + $0xe0] sm:$0xff]  ;;  %v1873_v36 = vld [vmem:[#allocation8 + $0xe8] sm:$0xff] }
  0x39   :  { %280 = vmatmul.f32.vlgmr.msra.gmra.mxu2 %v100_v0  ;;  %321 = vmatmul.f32.vlgmr.msra.gmra.mxu3 %v100_v0  ;;  %v1877_v37 = vld [vmem:[#allocation8 + $0xf0] sm:$0xff]  ;;  %v1879_v38 = vld [vmem:[#allocation8 + $0xf8] sm:$0xff]  ;;  %v1886_v40 = vld [vmem:[#allocation8 + $0xc0] sm:$0xff] }
  0x3a   :  { %470 = vmatpush.msrb.mxu0 %v1779_v1  ;;  %490 = vmatpush.msrb.mxu1 %v1781_v2  ;;  %v103_v39 = vld [vmem:[#allocation3 + $0x18] sm:$0xff]  ;;  %v1888_v41 = vld [vmem:[#allocation8 + $0xc8] sm:$0xff]  ;;  %v1891_v42 = vld [vmem:[#allocation8 + $0xd0] sm:$0xff] }
  0x3b   :  { %510 = vmatpush.msrb.mxu2 %v1783_v3  ;;  %530 = vmatpush.msrb.mxu3 %v1785_v4  ;;  %v1893_v43 = vld [vmem:[#allocation8 + $0xd8] sm:$0xff]  ;;  %v1895_v44 = vld [vmem:[#allocation8 + $0xa0] sm:$0xff]  ;;  %v1897_v45 = vld [vmem:[#allocation8 + $0xa8] sm:$0xff] }
  0x3c   :  { %471 = vmatpush.msrb.mxu0 %v1787_v5  ;;  %491 = vmatpush.msrb.mxu1 %v1789_v6  ;;  %2780 = vst [vmem:[#allocation17_spill] sm:$0xff] %v1895_v44  ;;  %v1901_v46 = vld [vmem:[#allocation8 + $0xb0] sm:$0xff]  ;;  %v1903_v47 = vld [vmem:[#allocation8 + $0xb8] sm:$0xff]  ;;  %v1907_v48 = vld [vmem:[#allocation8 + $0x80] sm:$0xff] }
  0x3d   :  { %511 = vmatpush.msrb.mxu2 %v1793_v7  ;;  %531 = vmatpush.msrb.mxu3 %v1795_v8  ;;  %2781 = vst [vmem:[#allocation18_spill] sm:$0xff] %v1897_v45  ;;  %v1909_v49 = vld [vmem:[#allocation8 + $0x88] sm:$0xff]  ;;  %v1913_v50 = vld [vmem:[#allocation8 + $0x90] sm:$0xff]  ;;  %v1915_v51 = vld [vmem:[#allocation8 + $0x98] sm:$0xff] }
  0x3e   :  { %472 = vmatpush.msrb.mxu0 %v1799_v9  ;;  %492 = vmatpush.msrb.mxu1 %v1801_v10  ;;  %2782 = vst [vmem:[#allocation19_spill] sm:$0xff] %v1901_v46  ;;  %v104_v52 = vld [vmem:[#allocation3 + $0x20] sm:$0xff]  ;;  %v1924_v54 = vld [vmem:[#allocation8 + $0x68] sm:$0xff]  ;;  %v1927_v55 = vld [vmem:[#allocation8 + $0x70] sm:$0xff] }
  0x3f   :  { %512 = vmatpush.msrb.mxu2 %v1805_v11  ;;  %532 = vmatpush.msrb.mxu3 %v1807_v12  ;;  %2783 = vst [vmem:[#allocation20_spill] sm:$0xff] %v1903_v47  ;;  %v1922_v53 = vld [vmem:[#allocation8 + $0x60] sm:$0xff]  ;;  %v1929_v56 = vld [vmem:[#allocation8 + $0x78] sm:$0xff]  ;;  %v1933_v58 = vld [vmem:[#allocation8 + $0x48] sm:$0xff] }
  0x40   :  { %201 = vmatmul.f32.gmra.mxu0 %v101_v13  ;;  %242 = vmatmul.f32.gmra.mxu1 %v101_v13  ;;  %2784 = vst [vmem:[#allocation21_spill] sm:$0xff] %v1907_v48  ;;  %v1931_v57 = vld [vmem:[#allocation8 + $0x40] sm:$0xff]  ;;  %v1937_v59 = vld [vmem:[#allocation8 + $0x50] sm:$0xff]  ;;  %v1939_v60 = vld [vmem:[#allocation8 + $0x58] sm:$0xff] }
  0x41   :  { %283 = vmatmul.f32.gmra.mxu2 %v101_v13  ;;  %324 = vmatmul.f32.gmra.mxu3 %v101_v13  ;;  %2785 = vst [vmem:[#allocation22_spill] sm:$0xff] %v1909_v49  ;;  %v1943_v61 = vld [vmem:[#allocation8 + $0x20] sm:$0xff]  ;;  %v1945_v62 = vld [vmem:[#allocation8 + $0x28] sm:$0xff]  ;;  %v1949_v63 = vld [vmem:[#allocation8 + $0x30] sm:$0xff] }
  0x42   :  { %473 = vmatpush.msrb.mxu0 %v1814_v14  ;;  %493 = vmatpush.msrb.mxu1 %v1816_v15  ;;  %2786 = vst [vmem:[#allocation23_spill] sm:$0xff] %v1913_v50  ;;  %v1951_v0 = vld [vmem:[#allocation8 + $0x38] sm:$0xff]  ;;  %v105_v13 = vld [vmem:[#allocation3 + $0x28] sm:$0xff] }
  0x43   :  { %513 = vmatpush.msrb.mxu2 %v1819_v16  ;;  %533 = vmatpush.msrb.mxu3 %v1821_v17  ;;  %2787 = vst [vmem:[#allocation24_spill] sm:$0xff] %v1915_v51 }
  0x44   :  { %474 = vmatpush.msrb.mxu0 %v1823_v18  ;;  %494 = vmatpush.msrb.mxu1 %v1825_v19  ;;  %2788 = vst [vmem:[#allocation25_spill] sm:$0xff] %v1922_v53 }
  0x45   :  { %514 = vmatpush.msrb.mxu2 %v1829_v20  ;;  %534 = vmatpush.msrb.mxu3 %v1831_v21  ;;  %2789 = vst [vmem:[#allocation26_spill] sm:$0xff] %v1924_v54 }
  0x46   :  { %475 = vmatpush.msrb.mxu0 %v1835_v22  ;;  %495 = vmatpush.msrb.mxu1 %v1837_v23  ;;  %2790 = vst [vmem:[#allocation27_spill] sm:$0xff] %v1927_v55 }
  0x47   :  { %515 = vmatpush.msrb.mxu2 %v1841_v24  ;;  %535 = vmatpush.msrb.mxu3 %v1843_v25  ;;  %2791 = vst [vmem:[#allocation28_spill] sm:$0xff] %v1929_v56 }
  0x48   :  { %204 = vmatmul.f32.gmra.mxu0 %v102_v26  ;;  %245 = vmatmul.f32.gmra.mxu1 %v102_v26  ;;  %2792 = vst [vmem:[#allocation29_spill] sm:$0xff] %v1931_v57 }
  0x49   :  { %286 = vmatmul.f32.gmra.mxu2 %v102_v26  ;;  %327 = vmatmul.f32.gmra.mxu3 %v102_v26  ;;  %2793 = vst [vmem:[#allocation30_spill] sm:$0xff] %v1933_v58  ;;  %v1958_v26 = vld [vmem:[#allocation8] sm:$0xff] }
  0x4a   :  { %476 = vmatpush.msrb.mxu0 %v1850_v27  ;;  %496 = vmatpush.msrb.mxu1 %v1852_v28  ;;  %2794 = vst [vmem:[#allocation31_spill] sm:$0xff] %v1937_v59 }
  0x4b   :  { %516 = vmatpush.msrb.mxu2 %v1855_v29  ;;  %536 = vmatpush.msrb.mxu3 %v1857_v30  ;;  %2795 = vst [vmem:[#allocation32_spill] sm:$0xff] %v1939_v60 }
  0x4c   :  { %477 = vmatpush.msrb.mxu0 %v1859_v31  ;;  %497 = vmatpush.msrb.mxu1 %v1861_v32  ;;  %2796 = vst [vmem:[#allocation33_spill] sm:$0xff] %v1943_v61 }
  0x4d   :  { %517 = vmatpush.msrb.mxu2 %v1865_v33  ;;  %537 = vmatpush.msrb.mxu3 %v1867_v34  ;;  %2797 = vst [vmem:[#allocation34_spill] sm:$0xff] %v1945_v62 }
  0x4e   :  { %478 = vmatpush.msrb.mxu0 %v1871_v35  ;;  %498 = vmatpush.msrb.mxu1 %v1873_v36  ;;  %2798 = vst [vmem:[#allocation35_spill] sm:$0xff] %v1949_v63 }
  0x4f   :  { %518 = vmatpush.msrb.mxu2 %v1877_v37  ;;  %538 = vmatpush.msrb.mxu3 %v1879_v38  ;;  %2799 = vst [vmem:[#allocation36_spill] sm:$0xff] %v1951_v0 }
  0x50   :  { %207 = vmatmul.f32.gmra.mxu0 %v103_v39  ;;  %248 = vmatmul.f32.gmra.mxu1 %v103_v39  ;;  %2800 = vst [vmem:[#allocation37_spill] sm:$0xff] %v1958_v26 }
  0x51   :  { %289 = vmatmul.f32.gmra.mxu2 %v103_v39  ;;  %330 = vmatmul.f32.gmra.mxu3 %v103_v39  ;;  %v1960_v39 = vld [vmem:[#allocation8 + $0x8] sm:$0xff] }
  0x52   :  { %479 = vmatpush.msrb.mxu0 %v1886_v40  ;;  %499 = vmatpush.msrb.mxu1 %v1888_v41  ;;  %2801 = vst [vmem:[#allocation38_spill] sm:$0xff] %v1960_v39 }
  0x53   :  { %519 = vmatpush.msrb.mxu2 %v1891_v42  ;;  %539 = vmatpush.msrb.mxu3 %v1893_v43 }
  0x54   :  { %480 = vmatpush.msrb.mxu0 %v1895_v44  ;;  %500 = vmatpush.msrb.mxu1 %v1897_v45 }
  0x55   :  { %520 = vmatpush.msrb.mxu2 %v1901_v46  ;;  %540 = vmatpush.msrb.mxu3 %v1903_v47 }
  0x56   :  { %481 = vmatpush.msrb.mxu0 %v1907_v48  ;;  %501 = vmatpush.msrb.mxu1 %v1909_v49 }
  0x57   :  { %521 = vmatpush.msrb.mxu2 %v1913_v50  ;;  %541 = vmatpush.msrb.mxu3 %v1915_v51 }
  0x58   :  { %210 = vmatmul.f32.gmra.mxu0 %v104_v52  ;;  %251 = vmatmul.f32.gmra.mxu1 %v104_v52 }
  0x59   :  { %292 = vmatmul.f32.gmra.mxu2 %v104_v52  ;;  %333 = vmatmul.f32.gmra.mxu3 %v104_v52  ;;  %v1963_v52 = vld [vmem:[#allocation8 + $0x10] sm:$0xff] }
  0x5a   :  { %482 = vmatpush.msrb.mxu0 %v1922_v53  ;;  %502 = vmatpush.msrb.mxu1 %v1924_v54  ;;  %2802 = vst [vmem:[#allocation39_spill] sm:$0xff] %v1963_v52 }
  0x5b   :  { %522 = vmatpush.msrb.mxu2 %v1927_v55  ;;  %542 = vmatpush.msrb.mxu3 %v1929_v56 }
  0x5c   :  { %483 = vmatpush.msrb.mxu0 %v1931_v57  ;;  %503 = vmatpush.msrb.mxu1 %v1933_v58  ;;  %v1965_v58 = vld [vmem:[#allocation8 + $0x18] sm:$0xff] }
  0x5d   :  { %523 = vmatpush.msrb.mxu2 %v1937_v59  ;;  %543 = vmatpush.msrb.mxu3 %v1939_v60  ;;  %2803 = vst [vmem:[#allocation40_spill] sm:$0xff] %v1965_v58 }
  0x5e   :  { %484 = vmatpush.msrb.mxu0 %v1943_v61  ;;  %504 = vmatpush.msrb.mxu1 %v1945_v62 }
  0x5f   :  { %524 = vmatpush.msrb.mxu2 %v1949_v63  ;;  %544 = vmatpush.msrb.mxu3 %v1951_v0  ;;  %v106_v0 = vld [vmem:[#allocation3 + $0x30] sm:$0xff] }
  0x60   :  { %213 = vmatmul.f32.gmra.mxu0 %v105_v13  ;;  %254 = vmatmul.f32.gmra.mxu1 %v105_v13 }
  0x61   :  { %295 = vmatmul.f32.gmra.mxu2 %v105_v13  ;;  %336 = vmatmul.f32.gmra.mxu3 %v105_v13  ;;  %v107_v13 = vld [vmem:[#allocation3 + $0x38] sm:$0xff] }
  0x62   :  { %485 = vmatpush.msrb.mxu0 %v1958_v26  ;;  %505 = vmatpush.msrb.mxu1 %v1960_v39 }
  0x63   :  { %525 = vmatpush.msrb.mxu2 %v1963_v52  ;;  %545 = vmatpush.msrb.mxu3 %v1965_v58 }
  0x64   :  { %580 = vmatpush.msra.mxu0 %v1779_v1  ;;  %600 = vmatpush.msra.mxu1 %v1781_v2 }
  0x65   :  { %620 = vmatpush.msra.mxu2 %v1783_v3  ;;  %640 = vmatpush.msra.mxu3 %v1785_v4 }
  0x66   :  { %581 = vmatpush.msra.mxu0 %v1787_v5  ;;  %601 = vmatpush.msra.mxu1 %v1789_v6 }
  0x67   :  { %621 = vmatpush.msra.mxu2 %v1793_v7  ;;  %641 = vmatpush.msra.mxu3 %v1795_v8 }
  0x68   :  { %216 = vmatmul.f32.gmra.mxu0 %v106_v0  ;;  %257 = vmatmul.f32.gmra.mxu1 %v106_v0 }
  0x69   :  { %298 = vmatmul.f32.gmra.mxu2 %v106_v0  ;;  %339 = vmatmul.f32.gmra.mxu3 %v106_v0  ;;  %v1727_v0 = vmov 0.0  }
  0x6a   :  { %582 = vmatpush.msra.mxu0 %v1799_v9  ;;  %602 = vmatpush.msra.mxu1 %v1801_v10 }
  0x6b   :  { %622 = vmatpush.msra.mxu2 %v1805_v11  ;;  %642 = vmatpush.msra.mxu3 %v1807_v12 }
  0x6c   :  { %583 = vmatpush.msra.mxu0 %v1814_v14  ;;  %603 = vmatpush.msra.mxu1 %v1816_v15 }
  0x6d   :  { %623 = vmatpush.msra.mxu2 %v1819_v16  ;;  %643 = vmatpush.msra.mxu3 %v1821_v17 }
  0x6e   :  { %584 = vmatpush.msra.mxu0 %v1823_v18  ;;  %604 = vmatpush.msra.mxu1 %v1825_v19 }
  0x6f   :  { %624 = vmatpush.msra.mxu2 %v1829_v20  ;;  %644 = vmatpush.msra.mxu3 %v1831_v21 }
  0x70   :  { %219 = vmatmul.f32.gmra.mxu0 %v107_v13  ;;  %260 = vmatmul.f32.gmra.mxu1 %v107_v13 }
  0x71   :  { %301 = vmatmul.f32.gmra.mxu2 %v107_v13  ;;  %342 = vmatmul.f32.gmra.mxu3 %v107_v13  ;;  %v2804_v13 = vld [vmem:[#allocation30_spill] sm:$0xff] }
  0x72   :  { %585 = vmatpush.msra.mxu0 %v1835_v22  ;;  %605 = vmatpush.msra.mxu1 %v1837_v23 }
  0x73   :  { %625 = vmatpush.msra.mxu2 %v1841_v24  ;;  %645 = vmatpush.msra.mxu3 %v1843_v25 }
  0x74   :  { %586 = vmatpush.msra.mxu0 %v1850_v27  ;;  %606 = vmatpush.msra.mxu1 %v1852_v28 }
  0x75   :  { %626 = vmatpush.msra.mxu2 %v1855_v29  ;;  %646 = vmatpush.msra.mxu3 %v1857_v30 }
  0x76   :  { %587 = vmatpush.msra.mxu0 %v1859_v31  ;;  %607 = vmatpush.msra.mxu1 %v1861_v32 }
  0x77   :  { %627 = vmatpush.msra.mxu2 %v1865_v33  ;;  %647 = vmatpush.msra.mxu3 %v1867_v34 }
  0x78   :  { %486 = vmatmul.f32.vlgmr.msrb.gmra.mxu0 %v1727_v0  ;;  %506 = vmatmul.f32.vlgmr.msrb.gmra.mxu1 %v1727_v0 }
  0x79   :  { %526 = vmatmul.f32.vlgmr.msrb.gmra.mxu2 %v1727_v0  ;;  %546 = vmatmul.f32.vlgmr.msrb.gmra.mxu3 %v1727_v0  ;;  %v2805_v0 = vld [vmem:[#allocation36_spill] sm:$0xff] }
  0x7a   :  { %588 = vmatpush.msra.mxu0 %v1871_v35  ;;  %608 = vmatpush.msra.mxu1 %v1873_v36 }
  0x7b   :  { %628 = vmatpush.msra.mxu2 %v1877_v37  ;;  %648 = vmatpush.msra.mxu3 %v1879_v38 }
  0x7c   :  { %589 = vmatpush.msra.mxu0 %v1886_v40  ;;  %609 = vmatpush.msra.mxu1 %v1888_v41 }
  0x7d   :  { %629 = vmatpush.msra.mxu2 %v1891_v42  ;;  %649 = vmatpush.msra.mxu3 %v1893_v43 }
  0x7e   :  { %590 = vmatpush.msra.mxu0 %v1895_v44  ;;  %610 = vmatpush.msra.mxu1 %v1897_v45 }
  0x7f   :  { %630 = vmatpush.msra.mxu2 %v1901_v46  ;;  %650 = vmatpush.msra.mxu3 %v1903_v47 }
  0x80   :  { %591 = vmatpush.msra.mxu0 %v1907_v48  ;;  %611 = vmatpush.msra.mxu1 %v1909_v49 }
  0x81   :  { %631 = vmatpush.msra.mxu2 %v1913_v50  ;;  %651 = vmatpush.msra.mxu3 %v1915_v51 }
  0x82   :  { %592 = vmatpush.msra.mxu0 %v1922_v53  ;;  %612 = vmatpush.msra.mxu1 %v1924_v54 }
  0x83   :  { %632 = vmatpush.msra.mxu2 %v1927_v55  ;;  %652 = vmatpush.msra.mxu3 %v1929_v56 }
  0x84   :  { %593 = vmatpush.msra.mxu0 %v1931_v57  ;;  %613 = vmatpush.msra.mxu1 %v2804_v13 }
  0x85   :  { %633 = vmatpush.msra.mxu2 %v1937_v59  ;;  %653 = vmatpush.msra.mxu3 %v1939_v60 }
  0x86   :  { %594 = vmatpush.msra.mxu0 %v1943_v61  ;;  %614 = vmatpush.msra.mxu1 %v1945_v62 }
  0x87   :  { %634 = vmatpush.msra.mxu2 %v1949_v63  ;;  %654 = vmatpush.msra.mxu3 %v2805_v0 }
  0x88   :  { %595 = vmatpush.msra.mxu0 %v1958_v26  ;;  %615 = vmatpush.msra.mxu1 %v1960_v39 }
  0x89   :  { %635 = vmatpush.msra.mxu2 %v1963_v52  ;;  %655 = vmatpush.msra.mxu3 %v1965_v58 }
  0x8a   :  { %690 = vmatpush.msrb.mxu0 %v1779_v1  ;;  %710 = vmatpush.msrb.mxu1 %v1781_v2 }
  0x8b   :  { %730 = vmatpush.msrb.mxu2 %v1783_v3  ;;  %750 = vmatpush.msrb.mxu3 %v1785_v4 }
  0x8c   :  { %691 = vmatpush.msrb.mxu0 %v1787_v5  ;;  %711 = vmatpush.msrb.mxu1 %v1789_v6 }
  0x8d   :  { %731 = vmatpush.msrb.mxu2 %v1793_v7  ;;  %751 = vmatpush.msrb.mxu3 %v1795_v8 }
  0x8e   :  { %692 = vmatpush.msrb.mxu0 %v1799_v9  ;;  %712 = vmatpush.msrb.mxu1 %v1801_v10 }
  0x8f   :  { %732 = vmatpush.msrb.mxu2 %v1805_v11  ;;  %752 = vmatpush.msrb.mxu3 %v1807_v12 }
  0x90   :  { %693 = vmatpush.msrb.mxu0 %v1814_v14  ;;  %713 = vmatpush.msrb.mxu1 %v1816_v15 }
  0x91   :  { %733 = vmatpush.msrb.mxu2 %v1819_v16  ;;  %753 = vmatpush.msrb.mxu3 %v1821_v17 }
  0x92   :  { %694 = vmatpush.msrb.mxu0 %v1823_v18  ;;  %714 = vmatpush.msrb.mxu1 %v1825_v19 }
  0x93   :  { %734 = vmatpush.msrb.mxu2 %v1829_v20  ;;  %754 = vmatpush.msrb.mxu3 %v1831_v21 }
  0x94   :  { %695 = vmatpush.msrb.mxu0 %v1835_v22  ;;  %715 = vmatpush.msrb.mxu1 %v1837_v23 }
  0x95   :  { %735 = vmatpush.msrb.mxu2 %v1841_v24  ;;  %755 = vmatpush.msrb.mxu3 %v1843_v25 }
  0x96   :  { %696 = vmatpush.msrb.mxu0 %v1850_v27  ;;  %716 = vmatpush.msrb.mxu1 %v1852_v28 }
  0x97   :  { %736 = vmatpush.msrb.mxu2 %v1855_v29  ;;  %756 = vmatpush.msrb.mxu3 %v1857_v30 }
  0x98   :  { %697 = vmatpush.msrb.mxu0 %v1859_v31  ;;  %717 = vmatpush.msrb.mxu1 %v1861_v32 }
  0x99   :  { %737 = vmatpush.msrb.mxu2 %v1865_v33  ;;  %757 = vmatpush.msrb.mxu3 %v1867_v34 }
  0x9a   :  { %698 = vmatpush.msrb.mxu0 %v1871_v35  ;;  %718 = vmatpush.msrb.mxu1 %v1873_v36 }
  0x9b   :  { %738 = vmatpush.msrb.mxu2 %v1877_v37  ;;  %758 = vmatpush.msrb.mxu3 %v1879_v38 }
  0x9c   :  { %699 = vmatpush.msrb.mxu0 %v1886_v40  ;;  %719 = vmatpush.msrb.mxu1 %v1888_v41 }
  0x9d   :  { %739 = vmatpush.msrb.mxu2 %v1891_v42  ;;  %759 = vmatpush.msrb.mxu3 %v1893_v43 }
  0x9e   :  { %700 = vmatpush.msrb.mxu0 %v1895_v44  ;;  %720 = vmatpush.msrb.mxu1 %v1897_v45 }
  0x9f   :  { %740 = vmatpush.msrb.mxu2 %v1901_v46  ;;  %760 = vmatpush.msrb.mxu3 %v1903_v47 }
  0xa0   :  { %701 = vmatpush.msrb.mxu0 %v1907_v48  ;;  %721 = vmatpush.msrb.mxu1 %v1909_v49 }
  0xa1   :  { %741 = vmatpush.msrb.mxu2 %v1913_v50  ;;  %761 = vmatpush.msrb.mxu3 %v1915_v51 }
  0xa2   :  { %702 = vmatpush.msrb.mxu0 %v1922_v53  ;;  %722 = vmatpush.msrb.mxu1 %v1924_v54 }
  0xa3   :  { %742 = vmatpush.msrb.mxu2 %v1927_v55  ;;  %762 = vmatpush.msrb.mxu3 %v1929_v56 }
  0xa4   :  { %703 = vmatpush.msrb.mxu0 %v1931_v57  ;;  %723 = vmatpush.msrb.mxu1 %v2804_v13  ;;  %v172_v57 = vld [vmem:[#allocation9] sm:$0xf] }
  0xa5   :  { %743 = vmatpush.msrb.mxu2 %v1937_v59  ;;  %763 = vmatpush.msrb.mxu3 %v1939_v60  ;;  %v174_v60 = vperm.slane %v172_v57, 0  ;;  %v175_v56 = vperm.slane %v172_v57, 1 }
  0xa6   :  { %704 = vmatpush.msrb.mxu0 %v1943_v61  ;;  %724 = vmatpush.msrb.mxu1 %v1945_v62 }
  0xa7   :  { %744 = vmatpush.msrb.mxu2 %v1949_v63  ;;  %764 = vmatpush.msrb.mxu3 %v2805_v0 }
  0xa8   :  { %705 = vmatpush.msrb.mxu0 %v1958_v26  ;;  %725 = vmatpush.msrb.mxu1 %v1960_v39  ;;  %v2107_v39 = vperm.slane %v172_v57, 2 }
  0xa9   :  { %745 = vmatpush.msrb.mxu2 %v1963_v52  ;;  %765 = vmatpush.msrb.mxu3 %v1965_v58  ;;  %v2109_v52 = vperm.slane %v172_v57, 3 }
  0xb5   :  { %v199_v13 = vpop.f32.mrf.mxu0  ;;  %v240_v59 = vpop.f32.mrf.mxu1 }
  0xbc   :  { %v2099_v61 = vpop.f32.mrf.mxu2  ;;  %v2101_v62 = vpop.f32.mrf.mxu3 }
  0xbd   :  { %v202_v63 = vpop.f32.mrf.mxu0  ;;  %v243_v55 = vpop.f32.mrf.mxu1 }
  0xbe   :  { %v2103_v0 = vadd.f32 %v202_v63, %v174_v60  ;;  %v2105_v26 = vadd.f32 %v243_v55, %v175_v56 }
  0xc0   :  { %2806 = vst [vmem:[#allocation41_spill] sm:$0xff] %v2103_v0 }
  0xc1   :  { %2807 = vst [vmem:[#allocation42_spill] sm:$0xff] %v2105_v26 }
  0xc4   :  { %v284_v58 = vpop.f32.mrf.mxu2  ;;  %v325_v54 = vpop.f32.mrf.mxu3 }
  0xc5   :  { %v2112_v53 = vadd.f32 %v284_v58, %v2107_v39  ;;  %v2115_v51 = vadd.f32 %v325_v54, %v2109_v52  ;;  %v205_v50 = vpop.f32.mrf.mxu0  ;;  %v246_v49 = vpop.f32.mrf.mxu1 }
  0xc6   :  { %v2117_v48 = vadd.f32 %v205_v50, %v174_v60  ;;  %v2119_v63 = vadd.f32 %v246_v49, %v175_v56 }
  0xc7   :  { %2808 = vst [vmem:[#allocation43_spill] sm:$0xff] %v2112_v53 }
  0xc8   :  { %2809 = vst [vmem:[#allocation44_spill] sm:$0xff] %v2115_v51 }
  0xc9   :  { %2810 = vst [vmem:[#allocation45_spill] sm:$0xff] %v2117_v48 }
  0xca   :  { %2811 = vst [vmem:[#allocation46_spill] sm:$0xff] %v2119_v63 }
  0xcc   :  { %v287_v55 = vpop.f32.mrf.mxu2  ;;  %v328_v26 = vpop.f32.mrf.mxu3 }
  0xcd   :  { %v2122_v0 = vadd.f32 %v287_v55, %v2107_v39  ;;  %v2125_v57 = vadd.f32 %v328_v26, %v2109_v52  ;;  %v208_v47 = vpop.f32.mrf.mxu0  ;;  %v249_v58 = vpop.f32.mrf.mxu1 }
  0xce   :  { %v2127_v53 = vadd.f32 %v208_v47, %v174_v60  ;;  %v2129_v54 = vadd.f32 %v249_v58, %v175_v56 }
  0xcf   :  { %2812 = vst [vmem:[#allocation47_spill] sm:$0xff] %v2122_v0 }
  0xd0   :  { %2813 = vst [vmem:[#allocation48_spill] sm:$0xff] %v2125_v57 }
  0xd1   :  { %2814 = vst [vmem:[#allocation49_spill] sm:$0xff] %v2127_v53 }
  0xd2   :  { %2815 = vst [vmem:[#allocation50_spill] sm:$0xff] %v2129_v54 }
  0xd4   :  { %v290_v51 = vpop.f32.mrf.mxu2  ;;  %v331_v46 = vpop.f32.mrf.mxu3 }
  0xd5   :  { %v2132_v50 = vadd.f32 %v290_v51, %v2107_v39  ;;  %v2135_v49 = vadd.f32 %v331_v46, %v2109_v52  ;;  %v211_v63 = vpop.f32.mrf.mxu0  ;;  %v252_v55 = vpop.f32.mrf.mxu1 }
  0xd6   :  { %v2137_v0 = vadd.f32 %v211_v63, %v174_v60  ;;  %v2139_v26 = vadd.f32 %v252_v55, %v175_v56 }
  0xd7   :  { %2816 = vst [vmem:[#allocation51_spill] sm:$0xff] %v2132_v50 }
  0xd8   :  { %2817 = vst [vmem:[#allocation52_spill] sm:$0xff] %v2135_v49 }
  0xd9   :  { %2818 = vst [vmem:[#allocation53_spill] sm:$0xff] %v2137_v0 }
  0xda   :  { %2819 = vst [vmem:[#allocation54_spill] sm:$0xff] %v2139_v26 }
  0xdc   :  { %v293_v57 = vpop.f32.mrf.mxu2  ;;  %v334_v48 = vpop.f32.mrf.mxu3 }
  0xdd   :  { %v2142_v47 = vadd.f32 %v293_v57, %v2107_v39  ;;  %v2145_v58 = vadd.f32 %v334_v48, %v2109_v52  ;;  %v214_v54 = vpop.f32.mrf.mxu0  ;;  %v255_v51 = vpop.f32.mrf.mxu1 }
  0xde   :  { %v2147_v50 = vadd.f32 %v214_v54, %v174_v60  ;;  %v2149_v46 = vadd.f32 %v255_v51, %v175_v56 }
  0xdf   :  { %2820 = vst [vmem:[#allocation55_spill] sm:$0xff] %v2142_v47 }
  0xe0   :  { %2821 = vst [vmem:[#allocation56_spill] sm:$0xff] %v2145_v58 }
  0xe1   :  { %2822 = vst [vmem:[#allocation57_spill] sm:$0xff] %v2147_v50  ;;  %v241_v50 = vadd.f32 %v240_v59, %v175_v56 }
  0xe2   :  { %2823 = vst [vmem:[#allocation58_spill] sm:$0xff] %v2149_v46 }
  0xe4   :  { %v296_v49 = vpop.f32.mrf.mxu2  ;;  %v337_v53 = vpop.f32.mrf.mxu3 }
  0xe5   :  { %v2152_v63 = vadd.f32 %v296_v49, %v2107_v39  ;;  %v2155_v55 = vadd.f32 %v337_v53, %v2109_v52  ;;  %v217_v26 = vpop.f32.mrf.mxu0  ;;  %v258_v57 = vpop.f32.mrf.mxu1 }
  0xe6   :  { %v2157_v47 = vadd.f32 %v217_v26, %v174_v60  ;;  %v2159_v48 = vadd.f32 %v258_v57, %v175_v56 }
  0xe7   :  { %2824 = vst [vmem:[#allocation59_spill] sm:$0xff] %v2152_v63 }
  0xe8   :  { %2825 = vst [vmem:[#allocation60_spill] sm:$0xff] %v2155_v55  ;;  %v200_v55 = vadd.f32 %v199_v13, %v174_v60 }
  0xe9   :  { %2826 = vst [vmem:[#allocation61_spill] sm:$0xff] %v2157_v47 }
  0xea   :  { %2827 = vst [vmem:[#allocation62_spill] sm:$0xff] %v2159_v48 }
  0xec   :  { %v299_v58 = vpop.f32.mrf.mxu2  ;;  %v340_v0 = vpop.f32.mrf.mxu3 }
  0xed   :  { %v2162_v54 = vadd.f32 %v299_v58, %v2107_v39  ;;  %v2165_v51 = vadd.f32 %v340_v0, %v2109_v52  ;;  %v220_v46 = vpop.f32.mrf.mxu0  ;;  %v261_v49 = vpop.f32.mrf.mxu1 }
  0xee   :  { %v2167_v63 = vadd.f32 %v220_v46, %v174_v60  ;;  %v2169_v53 = vadd.f32 %v261_v49, %v175_v56  ;;  %v282_v46 = vadd.f32 %v2099_v61, %v2107_v39  ;;  %v323_v56 = vadd.f32 %v2101_v62, %v2109_v52 }
  0xef   :  { %2828 = vst [vmem:[#allocation63_spill] sm:$0xff] %v2162_v54 }
  0xf0   :  { %2829 = vst [vmem:[#allocation64_spill] sm:$0xff] %v2165_v51 }
  0xf1   :  { %2830 = vst [vmem:[#allocation65_spill] sm:$0xff] %v2167_v63  ;;  %v2856_v63 = vld [vmem:[#allocation39_spill] sm:$0xff] }
  0xf2   :  { %2831 = vst [vmem:[#allocation66_spill] sm:$0xff] %v2169_v53  ;;  %v2855_v53 = vld [vmem:[#allocation38_spill] sm:$0xff] }
  0xf4   :  { %v302_v26 = vpop.f32.mrf.mxu2  ;;  %v343_v47 = vpop.f32.mrf.mxu3 }
  0xf5   :  { %v2172_v57 = vadd.f32 %v302_v26, %v2107_v39  ;;  %v2175_v48 = vadd.f32 %v343_v47, %v2109_v52  ;;  %v487_v58 = vpop.f32.mrf.mxu0  ;;  %v507_v54 = vpop.f32.mrf.mxu1 }
  0xf6   :  { %v550_v0 = vadd.f32 %v487_v58, %v200_v55  ;;  %v551_v51 = vadd.f32 %v507_v54, %v241_v50 }
  0xf7   :  { %2832 = vst [vmem:[#allocation67_spill] sm:$0xff] %v2172_v57  ;;  %v2854_v57 = vld [vmem:[#allocation37_spill] sm:$0xff] }
  0xf8   :  { %2833 = vst [vmem:[#allocation68_spill] sm:$0xff] %v2175_v48  ;;  %v554_v45 = vmul.f32 0.5, %v550_v0  ;;  %v555_v44 = vmul.f32 0.5, %v551_v51 }
  0xfa   :  { %1422 = vtanh.f32 %v554_v45 }
  0xfb   :  { %1424 = vtanh.f32 %v555_v44 }
  0xfc   :  { %v527_v59 = vpop.f32.mrf.mxu2  ;;  %v547_v60 = vpop.f32.mrf.mxu3 }
  0xfd   :  { %v552_v13 = vadd.f32 %v527_v59, %v282_v46  ;;  %v553_v49 = vadd.f32 %v547_v60, %v323_v56  ;;  %v2835_v56 = vld [vmem:[#allocation18_spill] sm:$0xff]  ;;  %v2836_v59 = vld [vmem:[#allocation19_spill] sm:$0xff]  ;;  %v2837_v60 = vld [vmem:[#allocation20_spill] sm:$0xff] }
  0xff   :  { %1426 = vtanh.f32 %v552_v13  ;;  %v557_v47 = vmul.f32 0.5, %v553_v49  ;;  %v2838_v13 = vld [vmem:[#allocation21_spill] sm:$0xff]  ;;  %v2839_v49 = vld [vmem:[#allocation22_spill] sm:$0xff] }
 0x100   :  { %v1423_v26 = vpop.eup %1422 }
 0x101   :  { %v1425_v48 = vpop.eup %1424  ;;  %v562_v55 = vmul.f32 0.5, %v1423_v26  ;;  %1428 = vtanh.f32 %v557_v47  ;;  %v2840_v47 = vld [vmem:[#allocation23_spill] sm:$0xff]  ;;  %v2841_v26 = vld [vmem:[#allocation24_spill] sm:$0xff] }
 0x102   :  { %v564_v50 = vmul.f32 0.5, %v1425_v48  ;;  %v2834_v48 = vld [vmem:[#allocation17_spill] sm:$0xff] }
 0x103   :  { %v563_v54 = vadd.f32 0.5, %v562_v55  ;;  %v2842_v55 = vld [vmem:[#allocation25_spill] sm:$0xff] }
 0x104   :  { %v565_v45 = vadd.f32 0.5, %v564_v50  ;;  %v2843_v50 = vld [vmem:[#allocation26_spill] sm:$0xff] }
 0x105   :  { %v1427_v51 = vpop.eup %1426 }
 0x106   :  { %v568_v58 = vmul.f32 0.0, %v565_v45  ;;  %v569_v61 = vmul.f32 %v1427_v51, %v563_v54  ;;  %v2844_v54 = vld [vmem:[#allocation27_spill] sm:$0xff]  ;;  %v2845_v45 = vld [vmem:[#allocation28_spill] sm:$0xff]  ;;  %v2846_v51 = vld [vmem:[#allocation29_spill] sm:$0xff] }
 0x107   :  { %v1429_v39 = vpop.eup %1428 }
 0x108   :  { %v2181_v0 = vadd.f32 %v569_v61, %v568_v58  ;;  %v566_v44 = vmul.f32 0.5, %v1429_v39  ;;  %v2847_v58 = vld [vmem:[#allocation30_spill] sm:$0xff]  ;;  %v2848_v61 = vld [vmem:[#allocation31_spill] sm:$0xff]  ;;  %v2849_v39 = vld [vmem:[#allocation32_spill] sm:$0xff] }
 0x10a   :  { %1430 = vtanh.f32 %v2181_v0  ;;  %v567_v62 = vadd.f32 0.5, %v566_v44  ;;  %v2850_v44 = vld [vmem:[#allocation33_spill] sm:$0xff] }
 0x110   :  { %v1431_v52 = vpop.eup %1430 }
 0x111   :  { %v572_v46 = vmul.f32 %v1431_v52, %v567_v62  ;;  %v2851_v62 = vld [vmem:[#allocation34_spill] sm:$0xff]  ;;  %v2852_v52 = vld [vmem:[#allocation35_spill] sm:$0xff] }
 0x113   :  { %596 = vmatmul.f32.vlgmr.msra.gmra.mxu0 %v572_v46  ;;  %616 = vmatmul.f32.vlgmr.msra.gmra.mxu1 %v572_v46 }
 0x114   :  { %636 = vmatmul.f32.vlgmr.msra.gmra.mxu2 %v572_v46  ;;  %656 = vmatmul.f32.vlgmr.msra.gmra.mxu3 %v572_v46  ;;  %v2853_v46 = vld [vmem:[#allocation36_spill] sm:$0xff] }
 0x115   :  { %800 = vmatpush.msra.mxu0 %v1779_v1  ;;  %820 = vmatpush.msra.mxu1 %v1781_v2 }
 0x116   :  { %840 = vmatpush.msra.mxu2 %v1783_v3  ;;  %860 = vmatpush.msra.mxu3 %v1785_v4 }
 0x117   :  { %801 = vmatpush.msra.mxu0 %v1787_v5  ;;  %821 = vmatpush.msra.mxu1 %v1789_v6 }
 0x118   :  { %841 = vmatpush.msra.mxu2 %v1793_v7  ;;  %861 = vmatpush.msra.mxu3 %v1795_v8 }
 0x119   :  { %802 = vmatpush.msra.mxu0 %v1799_v9  ;;  %822 = vmatpush.msra.mxu1 %v1801_v10 }
 0x11a   :  { %842 = vmatpush.msra.mxu2 %v1805_v11  ;;  %862 = vmatpush.msra.mxu3 %v1807_v12 }
 0x11b   :  { %803 = vmatpush.msra.mxu0 %v1814_v14  ;;  %823 = vmatpush.msra.mxu1 %v1816_v15 }
 0x11c   :  { %843 = vmatpush.msra.mxu2 %v1819_v16  ;;  %863 = vmatpush.msra.mxu3 %v1821_v17 }
 0x11d   :  { %804 = vmatpush.msra.mxu0 %v1823_v18  ;;  %824 = vmatpush.msra.mxu1 %v1825_v19 }
 0x11e   :  { %844 = vmatpush.msra.mxu2 %v1829_v20  ;;  %864 = vmatpush.msra.mxu3 %v1831_v21 }
 0x11f   :  { %805 = vmatpush.msra.mxu0 %v1835_v22  ;;  %825 = vmatpush.msra.mxu1 %v1837_v23 }
 0x120   :  { %845 = vmatpush.msra.mxu2 %v1841_v24  ;;  %865 = vmatpush.msra.mxu3 %v1843_v25 }
 0x121   :  { %806 = vmatpush.msra.mxu0 %v1850_v27  ;;  %826 = vmatpush.msra.mxu1 %v1852_v28 }
 0x122   :  { %846 = vmatpush.msra.mxu2 %v1855_v29  ;;  %866 = vmatpush.msra.mxu3 %v1857_v30 }
 0x123   :  { %807 = vmatpush.msra.mxu0 %v1859_v31  ;;  %827 = vmatpush.msra.mxu1 %v1861_v32 }
 0x124   :  { %847 = vmatpush.msra.mxu2 %v1865_v33  ;;  %867 = vmatpush.msra.mxu3 %v1867_v34 }
 0x125   :  { %808 = vmatpush.msra.mxu0 %v1871_v35  ;;  %828 = vmatpush.msra.mxu1 %v1873_v36 }
 0x126   :  { %848 = vmatpush.msra.mxu2 %v1877_v37  ;;  %868 = vmatpush.msra.mxu3 %v1879_v38 }
 0x127   :  { %809 = vmatpush.msra.mxu0 %v1886_v40  ;;  %829 = vmatpush.msra.mxu1 %v1888_v41 }
 0x128   :  { %849 = vmatpush.msra.mxu2 %v1891_v42  ;;  %869 = vmatpush.msra.mxu3 %v1893_v43 }
 0x129   :  { %810 = vmatpush.msra.mxu0 %v2834_v48  ;;  %830 = vmatpush.msra.mxu1 %v2835_v56 }
 0x12a   :  { %850 = vmatpush.msra.mxu2 %v2836_v59  ;;  %870 = vmatpush.msra.mxu3 %v2837_v60 }
 0x12b   :  { %811 = vmatpush.msra.mxu0 %v2838_v13  ;;  %831 = vmatpush.msra.mxu1 %v2839_v49 }
 0x12c   :  { %851 = vmatpush.msra.mxu2 %v2840_v47  ;;  %871 = vmatpush.msra.mxu3 %v2841_v26  ;;  %v2861_v26 = vld [vmem:[#allocation44_spill] sm:$0xff] }
 0x12d   :  { %812 = vmatpush.msra.mxu0 %v2842_v55  ;;  %832 = vmatpush.msra.mxu1 %v2843_v50  ;;  %v2860_v55 = vld [vmem:[#allocation43_spill] sm:$0xff] }
 0x12e   :  { %852 = vmatpush.msra.mxu2 %v2844_v54  ;;  %872 = vmatpush.msra.mxu3 %v2845_v45  ;;  %v2858_v45 = vld [vmem:[#allocation41_spill] sm:$0xff]  ;;  %v2859_v54 = vld [vmem:[#allocation42_spill] sm:$0xff] }
 0x12f   :  { %813 = vmatpush.msra.mxu0 %v2846_v51  ;;  %833 = vmatpush.msra.mxu1 %v2847_v58  ;;  %v2857_v51 = vld [vmem:[#allocation40_spill] sm:$0xff] }
 0x130   :  { %853 = vmatpush.msra.mxu2 %v2848_v61  ;;  %873 = vmatpush.msra.mxu3 %v2849_v39 }
 0x131   :  { %814 = vmatpush.msra.mxu0 %v2850_v44  ;;  %834 = vmatpush.msra.mxu1 %v2851_v62 }
 0x132   :  { %854 = vmatpush.msra.mxu2 %v2852_v52  ;;  %874 = vmatpush.msra.mxu3 %v2853_v46 }
 0x133   :  { %815 = vmatpush.msra.mxu0 %v2854_v57  ;;  %835 = vmatpush.msra.mxu1 %v2855_v53 }
 0x134   :  { %855 = vmatpush.msra.mxu2 %v2856_v63  ;;  %875 = vmatpush.msra.mxu3 %v2857_v51 }
 0x190   :  { %v597_v58 = vpop.f32.mrf.mxu0  ;;  %v617_v61 = vpop.f32.mrf.mxu1 }
 0x191   :  { %v660_v39 = vadd.f32 %v597_v58, %v2858_v45  ;;  %v661_v44 = vadd.f32 %v617_v61, %v2859_v54 }
 0x193   :  { %v664_v50 = vmul.f32 0.5, %v660_v39  ;;  %v665_v62 = vmul.f32 0.5, %v661_v44 }
 0x195   :  { %1432 = vtanh.f32 %v664_v50 }
 0x196   :  { %1434 = vtanh.f32 %v665_v62  ;;  %v2328_v62 = vld [vmem:[#allocation8 + $0x1e0] sm:$0xff] }
 0x197   :  { %v637_v52 = vpop.f32.mrf.mxu2  ;;  %v657_v46 = vpop.f32.mrf.mxu3 }
 0x198   :  { %v662_v57 = vadd.f32 %v637_v52, %v2860_v55  ;;  %v663_v53 = vadd.f32 %v657_v46, %v2861_v26  ;;  %v2331_v52 = vld [vmem:[#allocation8 + $0x1e8] sm:$0xff]  ;;  %v2334_v46 = vld [vmem:[#allocation8 + $0x1f0] sm:$0xff] }
 0x19a   :  { %1436 = vtanh.f32 %v662_v57  ;;  %v667_v63 = vmul.f32 0.5, %v663_v53 }
 0x19b   :  { %v1433_v47 = vpop.eup %1432 }
 0x19c   :  { %v1435_v51 = vpop.eup %1434  ;;  %v672_v49 = vmul.f32 0.5, %v1433_v47  ;;  %1438 = vtanh.f32 %v667_v63 }
 0x19d   :  { %v674_v13 = vmul.f32 0.5, %v1435_v51 }
 0x19e   :  { %v673_v45 = vadd.f32 0.5, %v672_v49 }
 0x19f   :  { %v675_v58 = vadd.f32 0.5, %v674_v13 }
 0x1a0   :  { %v1437_v54 = vpop.eup %1436 }
 0x1a1   :  { %v678_v61 = vmul.f32 %v675_v58, %v2181_v0  ;;  %v679_v50 = vmul.f32 %v1437_v54, %v673_v45  ;;  %v2337_v45 = vld [vmem:[#allocation8 + $0x1f8] sm:$0xff]  ;;  %v2340_v58 = vld [vmem:[#allocation8 + $0x1c0] sm:$0xff]  ;;  %v2343_v54 = vld [vmem:[#allocation8 + $0x1c8] sm:$0xff] }
 0x1a2   :  { %v1439_v39 = vpop.eup %1438 }
 0x1a3   :  { %v2253_v44 = vadd.f32 %v679_v50, %v678_v61  ;;  %v676_v55 = vmul.f32 0.5, %v1439_v39  ;;  %v2346_v61 = vld [vmem:[#allocation8 + $0x1d0] sm:$0xff]  ;;  %v2349_v50 = vld [vmem:[#allocation8 + $0x1d8] sm:$0xff]  ;;  %v2352_v39 = vld [vmem:[#allocation8 + $0x1a0] sm:$0xff] }
 0x1a5   :  { %1440 = vtanh.f32 %v2253_v44  ;;  %v677_v26 = vadd.f32 0.5, %v676_v55  ;;  %v2358_v55 = vld [vmem:[#allocation8 + $0x1b0] sm:$0xff] }
 0x1ab   :  { %v1441_v57 = vpop.eup %1440 }
 0x1ac   :  { %v682_v53 = vmul.f32 %v1441_v57, %v677_v26  ;;  %v2361_v26 = vld [vmem:[#allocation8 + $0x1b8] sm:$0xff]  ;;  %v2364_v57 = vld [vmem:[#allocation8 + $0x180] sm:$0xff] }
 0x1ae   :  { %706 = vmatmul.f32.vlgmr.msrb.gmra.mxu0 %v682_v53  ;;  %726 = vmatmul.f32.vlgmr.msrb.gmra.mxu1 %v682_v53 }
 0x1af   :  { %746 = vmatmul.f32.vlgmr.msrb.gmra.mxu2 %v682_v53  ;;  %766 = vmatmul.f32.vlgmr.msrb.gmra.mxu3 %v682_v53  ;;  %v2367_v53 = vld [vmem:[#allocation8 + $0x188] sm:$0xff] }
 0x1b0   :  { %910 = vmatpush.msrb.mxu0 %v1779_v1  ;;  %930 = vmatpush.msrb.mxu1 %v1781_v2  ;;  %v2862_v1 = vld [vmem:[#allocation21_spill] sm:$0xff]  ;;  %v2863_v2 = vld [vmem:[#allocation22_spill] sm:$0xff] }
 0x1b1   :  { %950 = vmatpush.msrb.mxu2 %v1783_v3  ;;  %970 = vmatpush.msrb.mxu3 %v1785_v4  ;;  %v2864_v3 = vld [vmem:[#allocation23_spill] sm:$0xff]  ;;  %v2865_v4 = vld [vmem:[#allocation24_spill] sm:$0xff] }
 0x1b2   :  { %911 = vmatpush.msrb.mxu0 %v1787_v5  ;;  %931 = vmatpush.msrb.mxu1 %v1789_v6  ;;  %v2866_v5 = vld [vmem:[#allocation25_spill] sm:$0xff]  ;;  %v2867_v6 = vld [vmem:[#allocation26_spill] sm:$0xff] }
 0x1b3   :  { %951 = vmatpush.msrb.mxu2 %v1793_v7  ;;  %971 = vmatpush.msrb.mxu3 %v1795_v8  ;;  %v2868_v7 = vld [vmem:[#allocation27_spill] sm:$0xff]  ;;  %v2869_v8 = vld [vmem:[#allocation28_spill] sm:$0xff] }
 0x1b4   :  { %912 = vmatpush.msrb.mxu0 %v1799_v9  ;;  %932 = vmatpush.msrb.mxu1 %v1801_v10  ;;  %v2870_v9 = vld [vmem:[#allocation29_spill] sm:$0xff]  ;;  %v2871_v10 = vld [vmem:[#allocation30_spill] sm:$0xff] }
 0x1b5   :  { %952 = vmatpush.msrb.mxu2 %v1805_v11  ;;  %972 = vmatpush.msrb.mxu3 %v1807_v12  ;;  %v2872_v11 = vld [vmem:[#allocation31_spill] sm:$0xff]  ;;  %v2873_v12 = vld [vmem:[#allocation32_spill] sm:$0xff] }
 0x1b6   :  { %913 = vmatpush.msrb.mxu0 %v1814_v14  ;;  %933 = vmatpush.msrb.mxu1 %v1816_v15  ;;  %v2874_v14 = vld [vmem:[#allocation33_spill] sm:$0xff]  ;;  %v2875_v15 = vld [vmem:[#allocation34_spill] sm:$0xff] }
 0x1b7   :  { %953 = vmatpush.msrb.mxu2 %v1819_v16  ;;  %973 = vmatpush.msrb.mxu3 %v1821_v17  ;;  %v2876_v16 = vld [vmem:[#allocation35_spill] sm:$0xff]  ;;  %v2877_v17 = vld [vmem:[#allocation36_spill] sm:$0xff] }
 0x1b8   :  { %914 = vmatpush.msrb.mxu0 %v1823_v18  ;;  %934 = vmatpush.msrb.mxu1 %v1825_v19  ;;  %v2878_v18 = vld [vmem:[#allocation37_spill] sm:$0xff]  ;;  %v2879_v19 = vld [vmem:[#allocation38_spill] sm:$0xff] }
 0x1b9   :  { %954 = vmatpush.msrb.mxu2 %v1829_v20  ;;  %974 = vmatpush.msrb.mxu3 %v1831_v21  ;;  %v2880_v20 = vld [vmem:[#allocation39_spill] sm:$0xff]  ;;  %v2881_v21 = vld [vmem:[#allocation40_spill] sm:$0xff] }
 0x1ba   :  { %915 = vmatpush.msrb.mxu0 %v1835_v22  ;;  %935 = vmatpush.msrb.mxu1 %v1837_v23 }
 0x1bb   :  { %955 = vmatpush.msrb.mxu2 %v1841_v24  ;;  %975 = vmatpush.msrb.mxu3 %v1843_v25  ;;  %v2882_v24 = vld [vmem:[#allocation45_spill] sm:$0xff] }
 0x1bc   :  { %916 = vmatpush.msrb.mxu0 %v1850_v27  ;;  %936 = vmatpush.msrb.mxu1 %v1852_v28  ;;  %v2883_v27 = vld [vmem:[#allocation46_spill] sm:$0xff] }
 0x1bd   :  { %956 = vmatpush.msrb.mxu2 %v1855_v29  ;;  %976 = vmatpush.msrb.mxu3 %v1857_v30 }
 0x1be   :  { %917 = vmatpush.msrb.mxu0 %v1859_v31  ;;  %937 = vmatpush.msrb.mxu1 %v1861_v32 }
 0x1bf   :  { %957 = vmatpush.msrb.mxu2 %v1865_v33  ;;  %977 = vmatpush.msrb.mxu3 %v1867_v34  ;;  %v2884_v33 = vld [vmem:[#allocation47_spill] sm:$0xff] }
 0x1c0   :  { %918 = vmatpush.msrb.mxu0 %v1871_v35  ;;  %938 = vmatpush.msrb.mxu1 %v1873_v36  ;;  %v2885_v35 = vld [vmem:[#allocation48_spill] sm:$0xff] }
 0x1c1   :  { %958 = vmatpush.msrb.mxu2 %v1877_v37  ;;  %978 = vmatpush.msrb.mxu3 %v1879_v38 }
 0x1c2   :  { %919 = vmatpush.msrb.mxu0 %v1886_v40  ;;  %939 = vmatpush.msrb.mxu1 %v1888_v41 }
 0x1c3   :  { %959 = vmatpush.msrb.mxu2 %v1891_v42  ;;  %979 = vmatpush.msrb.mxu3 %v1893_v43 }
 0x1c4   :  { %920 = vmatpush.msrb.mxu0 %v2834_v48  ;;  %940 = vmatpush.msrb.mxu1 %v2835_v56 }
 0x1c5   :  { %960 = vmatpush.msrb.mxu2 %v2836_v59  ;;  %980 = vmatpush.msrb.mxu3 %v2837_v60 }
 0x1c6   :  { %921 = vmatpush.msrb.mxu0 %v2862_v1  ;;  %941 = vmatpush.msrb.mxu1 %v2863_v2  ;;  %v2370_v1 = vld [vmem:[#allocation8 + $0x190] sm:$0xff]  ;;  %v2373_v2 = vld [vmem:[#allocation8 + $0x198] sm:$0xff] }
 0x1c7   :  { %961 = vmatpush.msrb.mxu2 %v2864_v3  ;;  %981 = vmatpush.msrb.mxu3 %v2865_v4  ;;  %v2376_v3 = vld [vmem:[#allocation8 + $0x160] sm:$0xff]  ;;  %v2379_v4 = vld [vmem:[#allocation8 + $0x168] sm:$0xff] }
 0x1c8   :  { %922 = vmatpush.msrb.mxu0 %v2866_v5  ;;  %942 = vmatpush.msrb.mxu1 %v2867_v6  ;;  %v2382_v5 = vld [vmem:[#allocation8 + $0x170] sm:$0xff]  ;;  %v2385_v6 = vld [vmem:[#allocation8 + $0x178] sm:$0xff] }
 0x1c9   :  { %962 = vmatpush.msrb.mxu2 %v2868_v7  ;;  %982 = vmatpush.msrb.mxu3 %v2869_v8  ;;  %v2388_v7 = vld [vmem:[#allocation8 + $0x140] sm:$0xff]  ;;  %v2391_v8 = vld [vmem:[#allocation8 + $0x148] sm:$0xff] }
 0x1ca   :  { %923 = vmatpush.msrb.mxu0 %v2870_v9  ;;  %943 = vmatpush.msrb.mxu1 %v2871_v10  ;;  %v2394_v9 = vld [vmem:[#allocation8 + $0x150] sm:$0xff]  ;;  %v2397_v10 = vld [vmem:[#allocation8 + $0x158] sm:$0xff] }
 0x1cb   :  { %963 = vmatpush.msrb.mxu2 %v2872_v11  ;;  %983 = vmatpush.msrb.mxu3 %v2873_v12  ;;  %v2400_v11 = vld [vmem:[#allocation8 + $0x120] sm:$0xff]  ;;  %v2403_v12 = vld [vmem:[#allocation8 + $0x128] sm:$0xff] }
 0x1cc   :  { %924 = vmatpush.msrb.mxu0 %v2874_v14  ;;  %944 = vmatpush.msrb.mxu1 %v2875_v15  ;;  %v2406_v14 = vld [vmem:[#allocation8 + $0x130] sm:$0xff]  ;;  %v2409_v15 = vld [vmem:[#allocation8 + $0x138] sm:$0xff] }
 0x1cd   :  { %964 = vmatpush.msrb.mxu2 %v2876_v16  ;;  %984 = vmatpush.msrb.mxu3 %v2877_v17  ;;  %v2412_v16 = vld [vmem:[#allocation8 + $0x100] sm:$0xff]  ;;  %v2415_v17 = vld [vmem:[#allocation8 + $0x108] sm:$0xff] }
 0x1ce   :  { %925 = vmatpush.msrb.mxu0 %v2878_v18  ;;  %945 = vmatpush.msrb.mxu1 %v2879_v19  ;;  %v2418_v18 = vld [vmem:[#allocation8 + $0x110] sm:$0xff]  ;;  %v2421_v19 = vld [vmem:[#allocation8 + $0x118] sm:$0xff] }
 0x1cf   :  { %965 = vmatpush.msrb.mxu2 %v2880_v20  ;;  %985 = vmatpush.msrb.mxu3 %v2881_v21  ;;  %v2424_v20 = vld [vmem:[#allocation8 + $0xe0] sm:$0xff]  ;;  %v2427_v21 = vld [vmem:[#allocation8 + $0xe8] sm:$0xff] }
 0x22b   :  { %v707_v22 = vpop.f32.mrf.mxu0  ;;  %v727_v23 = vpop.f32.mrf.mxu1 }
 0x22c   :  { %v770_v25 = vadd.f32 %v707_v22, %v2882_v24  ;;  %v771_v28 = vadd.f32 %v727_v23, %v2883_v27  ;;  %v2430_v22 = vld [vmem:[#allocation8 + $0xf0] sm:$0xff]  ;;  %v2433_v23 = vld [vmem:[#allocation8 + $0xf8] sm:$0xff]  ;;  %v2436_v24 = vld [vmem:[#allocation8 + $0xc0] sm:$0xff] }
 0x22d   :  { %v2442_v27 = vld [vmem:[#allocation8 + $0xd0] sm:$0xff] }
 0x22e   :  { %v774_v29 = vmul.f32 0.5, %v770_v25  ;;  %v775_v30 = vmul.f32 0.5, %v771_v28  ;;  %v2439_v25 = vld [vmem:[#allocation8 + $0xc8] sm:$0xff]  ;;  %v2445_v28 = vld [vmem:[#allocation8 + $0xd8] sm:$0xff] }
 0x230   :  { %1442 = vtanh.f32 %v774_v29  ;;  %v2448_v29 = vld [vmem:[#allocation8 + $0xa0] sm:$0xff] }
 0x231   :  { %1444 = vtanh.f32 %v775_v30  ;;  %v2451_v30 = vld [vmem:[#allocation8 + $0xa8] sm:$0xff] }
 0x232   :  { %v747_v31 = vpop.f32.mrf.mxu2  ;;  %v767_v32 = vpop.f32.mrf.mxu3 }
 0x233   :  { %v772_v34 = vadd.f32 %v747_v31, %v2884_v33  ;;  %v773_v36 = vadd.f32 %v767_v32, %v2885_v35  ;;  %v2454_v31 = vld [vmem:[#allocation8 + $0xb0] sm:$0xff]  ;;  %v2457_v32 = vld [vmem:[#allocation8 + $0xb8] sm:$0xff]  ;;  %v2460_v33 = vld [vmem:[#allocation8 + $0x80] sm:$0xff] }
 0x234   :  { %2886 = vst [vmem:[#allocation17_spill] sm:$0xff] %v2460_v33  ;;  %v2466_v35 = vld [vmem:[#allocation8 + $0x90] sm:$0xff] }
 0x235   :  { %1446 = vtanh.f32 %v772_v34  ;;  %v777_v37 = vmul.f32 0.5, %v773_v36  ;;  %v2463_v34 = vld [vmem:[#allocation8 + $0x88] sm:$0xff]  ;;  %2888 = vst [vmem:[#allocation19_spill] sm:$0xff] %v2466_v35  ;;  %v2469_v36 = vld [vmem:[#allocation8 + $0x98] sm:$0xff] }
 0x236   :  { %v1443_v38 = vpop.eup %1442  ;;  %2887 = vst [vmem:[#allocation18_spill] sm:$0xff] %v2463_v34 }
 0x237   :  { %v1445_v40 = vpop.eup %1444  ;;  %v782_v41 = vmul.f32 0.5, %v1443_v38  ;;  %1448 = vtanh.f32 %v777_v37  ;;  %2889 = vst [vmem:[#allocation20_spill] sm:$0xff] %v2469_v36  ;;  %v2472_v37 = vld [vmem:[#allocation8 + $0x60] sm:$0xff]  ;;  %v2475_v38 = vld [vmem:[#allocation8 + $0x68] sm:$0xff] }
 0x238   :  { %v784_v42 = vmul.f32 0.5, %v1445_v40  ;;  %2890 = vst [vmem:[#allocation41_spill] sm:$0xff] %v2472_v37  ;;  %v2478_v40 = vld [vmem:[#allocation8 + $0x70] sm:$0xff] }
 0x239   :  { %v783_v43 = vadd.f32 0.5, %v782_v41  ;;  %2891 = vst [vmem:[#allocation42_spill] sm:$0xff] %v2475_v38  ;;  %v2481_v41 = vld [vmem:[#allocation8 + $0x78] sm:$0xff] }
 0x23a   :  { %v785_v63 = vadd.f32 0.5, %v784_v42  ;;  %2892 = vst [vmem:[#allocation43_spill] sm:$0xff] %v2478_v40  ;;  %v2484_v42 = vld [vmem:[#allocation8 + $0x40] sm:$0xff] }
 0x23b   :  { %v1447_v0 = vpop.eup %1446  ;;  %2893 = vst [vmem:[#allocation44_spill] sm:$0xff] %v2481_v41 }
 0x23c   :  { %v788_v48 = vmul.f32 %v785_v63, %v2253_v44  ;;  %v789_v56 = vmul.f32 %v1447_v0, %v783_v43  ;;  %v2355_v44 = vld [vmem:[#allocation8 + $0x1a8] sm:$0xff]  ;;  %2894 = vst [vmem:[#allocation21_spill] sm:$0xff] %v2484_v42  ;;  %v2490_v63 = vld [vmem:[#allocation8 + $0x50] sm:$0xff]  ;;  %v2493_v0 = vld [vmem:[#allocation8 + $0x58] sm:$0xff] }
 0x23d   :  { %v1449_v59 = vpop.eup %1448  ;;  %v2487_v43 = vld [vmem:[#allocation8 + $0x48] sm:$0xff]  ;;  %2896 = vst [vmem:[#allocation23_spill] sm:$0xff] %v2490_v63 }
 0x23e   :  { %v2325_v60 = vadd.f32 %v789_v56, %v788_v48  ;;  %v786_v13 = vmul.f32 0.5, %v1449_v59  ;;  %2895 = vst [vmem:[#allocation22_spill] sm:$0xff] %v2487_v43  ;;  %v2496_v48 = vld [vmem:[#allocation8 + $0x20] sm:$0xff]  ;;  %v2499_v56 = vld [vmem:[#allocation8 + $0x28] sm:$0xff]  ;;  %v2502_v59 = vld [vmem:[#allocation8 + $0x30] sm:$0xff] }
 0x23f   :  { %2897 = vst [vmem:[#allocation24_spill] sm:$0xff] %v2493_v0 }
 0x240   :  { %1450 = vtanh.f32 %v2325_v60  ;;  %v787_v49 = vadd.f32 0.5, %v786_v13  ;;  %2898 = vst [vmem:[#allocation25_spill] sm:$0xff] %v2496_v48  ;;  %v2505_v13 = vld [vmem:[#allocation8 + $0x38] sm:$0xff] }
 0x241   :  { %2899 = vst [vmem:[#allocation26_spill] sm:$0xff] %v2499_v56 }
 0x242   :  { %2900 = vst [vmem:[#allocation27_spill] sm:$0xff] %v2502_v59 }
 0x243   :  { %2901 = vst [vmem:[#allocation28_spill] sm:$0xff] %v2505_v13 }
 0x246   :  { %v1451_v47 = vpop.eup %1450 }
 0x247   :  { %v792_v51 = vmul.f32 %v1451_v47, %v787_v49  ;;  %v2508_v49 = vld [vmem:[#allocation8] sm:$0xff]  ;;  %v2511_v47 = vld [vmem:[#allocation8 + $0x8] sm:$0xff] }
 0x248   :  { %2902 = vst [vmem:[#allocation29_spill] sm:$0xff] %v2508_v49 }
 0x249   :  { %816 = vmatmul.f32.vlgmr.msra.gmra.mxu0 %v792_v51  ;;  %836 = vmatmul.f32.vlgmr.msra.gmra.mxu1 %v792_v51  ;;  %2903 = vst [vmem:[#allocation30_spill] sm:$0xff] %v2511_v47 }
 0x24a   :  { %856 = vmatmul.f32.vlgmr.msra.gmra.mxu2 %v792_v51  ;;  %876 = vmatmul.f32.vlgmr.msra.gmra.mxu3 %v792_v51  ;;  %v2514_v51 = vld [vmem:[#allocation8 + $0x10] sm:$0xff] }
 0x24b   :  { %1020 = vmatpush.msra.mxu0 %v2328_v62  ;;  %1040 = vmatpush.msra.mxu1 %v2331_v52  ;;  %2904 = vst [vmem:[#allocation31_spill] sm:$0xff] %v2514_v51 }
 0x24c   :  { %1060 = vmatpush.msra.mxu2 %v2334_v46  ;;  %1080 = vmatpush.msra.mxu3 %v2337_v45 }
 0x24d   :  { %1021 = vmatpush.msra.mxu0 %v2340_v58  ;;  %1041 = vmatpush.msra.mxu1 %v2343_v54 }
 0x24e   :  { %1061 = vmatpush.msra.mxu2 %v2346_v61  ;;  %1081 = vmatpush.msra.mxu3 %v2349_v50 }
 0x24f   :  { %1022 = vmatpush.msra.mxu0 %v2352_v39  ;;  %1042 = vmatpush.msra.mxu1 %v2355_v44 }
 0x250   :  { %1062 = vmatpush.msra.mxu2 %v2358_v55  ;;  %1082 = vmatpush.msra.mxu3 %v2361_v26 }
 0x251   :  { %1023 = vmatpush.msra.mxu0 %v2364_v57  ;;  %1043 = vmatpush.msra.mxu1 %v2367_v53 }
 0x252   :  { %1063 = vmatpush.msra.mxu2 %v2370_v1  ;;  %1083 = vmatpush.msra.mxu3 %v2373_v2 }
 0x253   :  { %1024 = vmatpush.msra.mxu0 %v2376_v3  ;;  %1044 = vmatpush.msra.mxu1 %v2379_v4 }
 0x254   :  { %1064 = vmatpush.msra.mxu2 %v2382_v5  ;;  %1084 = vmatpush.msra.mxu3 %v2385_v6 }
 0x255   :  { %1025 = vmatpush.msra.mxu0 %v2388_v7  ;;  %1045 = vmatpush.msra.mxu1 %v2391_v8 }
 0x256   :  { %1065 = vmatpush.msra.mxu2 %v2394_v9  ;;  %1085 = vmatpush.msra.mxu3 %v2397_v10 }
 0x257   :  { %1026 = vmatpush.msra.mxu0 %v2400_v11  ;;  %1046 = vmatpush.msra.mxu1 %v2403_v12 }
 0x258   :  { %1066 = vmatpush.msra.mxu2 %v2406_v14  ;;  %1086 = vmatpush.msra.mxu3 %v2409_v15 }
 0x259   :  { %1027 = vmatpush.msra.mxu0 %v2412_v16  ;;  %1047 = vmatpush.msra.mxu1 %v2415_v17 }
 0x25a   :  { %1067 = vmatpush.msra.mxu2 %v2418_v18  ;;  %1087 = vmatpush.msra.mxu3 %v2421_v19 }
 0x25b   :  { %1028 = vmatpush.msra.mxu0 %v2424_v20  ;;  %1048 = vmatpush.msra.mxu1 %v2427_v21 }
 0x25c   :  { %1068 = vmatpush.msra.mxu2 %v2430_v22  ;;  %1088 = vmatpush.msra.mxu3 %v2433_v23 }
 0x25d   :  { %1029 = vmatpush.msra.mxu0 %v2436_v24  ;;  %1049 = vmatpush.msra.mxu1 %v2439_v25 }
 0x25e   :  { %1069 = vmatpush.msra.mxu2 %v2442_v27  ;;  %1089 = vmatpush.msra.mxu3 %v2445_v28 }
 0x25f   :  { %1030 = vmatpush.msra.mxu0 %v2448_v29  ;;  %1050 = vmatpush.msra.mxu1 %v2451_v30 }
 0x260   :  { %1070 = vmatpush.msra.mxu2 %v2454_v31  ;;  %1090 = vmatpush.msra.mxu3 %v2457_v32 }
 0x261   :  { %1031 = vmatpush.msra.mxu0 %v2460_v33  ;;  %1051 = vmatpush.msra.mxu1 %v2463_v34 }
 0x262   :  { %1071 = vmatpush.msra.mxu2 %v2466_v35  ;;  %1091 = vmatpush.msra.mxu3 %v2469_v36 }
 0x263   :  { %1032 = vmatpush.msra.mxu0 %v2472_v37  ;;  %1052 = vmatpush.msra.mxu1 %v2475_v38  ;;  %v2909_v37 = vld [vmem:[#allocation52_spill] sm:$0xff] }
 0x264   :  { %1072 = vmatpush.msra.mxu2 %v2478_v40  ;;  %1092 = vmatpush.msra.mxu3 %v2481_v41  ;;  %v2908_v40 = vld [vmem:[#allocation51_spill] sm:$0xff] }
 0x265   :  { %1033 = vmatpush.msra.mxu0 %v2484_v42  ;;  %1053 = vmatpush.msra.mxu1 %v2487_v43 }
 0x266   :  { %1073 = vmatpush.msra.mxu2 %v2490_v63  ;;  %1093 = vmatpush.msra.mxu3 %v2493_v0  ;;  %v2906_v0 = vld [vmem:[#allocation49_spill] sm:$0xff]  ;;  %v2907_v63 = vld [vmem:[#allocation50_spill] sm:$0xff] }
 0x267   :  { %1034 = vmatpush.msra.mxu0 %v2496_v48  ;;  %1054 = vmatpush.msra.mxu1 %v2499_v56  ;;  %v2517_v56 = vld [vmem:[#allocation8 + $0x18] sm:$0xff] }
 0x268   :  { %1074 = vmatpush.msra.mxu2 %v2502_v59  ;;  %1094 = vmatpush.msra.mxu3 %v2505_v13  ;;  %2905 = vst [vmem:[#allocation32_spill] sm:$0xff] %v2517_v56 }
 0x269   :  { %1035 = vmatpush.msra.mxu0 %v2508_v49  ;;  %1055 = vmatpush.msra.mxu1 %v2511_v47 }
 0x26a   :  { %1075 = vmatpush.msra.mxu2 %v2514_v51  ;;  %1095 = vmatpush.msra.mxu3 %v2517_v56 }
 0x2c6   :  { %v817_v59 = vpop.f32.mrf.mxu0  ;;  %v837_v48 = vpop.f32.mrf.mxu1 }
 0x2c7   :  { %v880_v13 = vadd.f32 %v817_v59, %v2906_v0  ;;  %v881_v43 = vadd.f32 %v837_v48, %v2907_v63 }
 0x2c9   :  { %v884_v42 = vmul.f32 0.5, %v880_v13  ;;  %v885_v49 = vmul.f32 0.5, %v881_v43 }
 0x2cb   :  { %1452 = vtanh.f32 %v884_v42 }
 0x2cc   :  { %1454 = vtanh.f32 %v885_v49  ;;  %v2916_v49 = vld [vmem:[#allocation43_spill] sm:$0xff] }
 0x2cd   :  { %v857_v41 = vpop.f32.mrf.mxu2  ;;  %v877_v47 = vpop.f32.mrf.mxu3 }
 0x2ce   :  { %v882_v38 = vadd.f32 %v857_v41, %v2908_v40  ;;  %v883_v51 = vadd.f32 %v877_v47, %v2909_v37  ;;  %v2917_v47 = vld [vmem:[#allocation44_spill] sm:$0xff] }
 0x2d0   :  { %1456 = vtanh.f32 %v882_v38  ;;  %v887_v36 = vmul.f32 0.5, %v883_v51  ;;  %v2918_v51 = vld [vmem:[#allocation21_spill] sm:$0xff] }
 0x2d1   :  { %v1453_v35 = vpop.eup %1452 }
 0x2d2   :  { %v1455_v56 = vpop.eup %1454  ;;  %v892_v34 = vmul.f32 0.5, %v1453_v35  ;;  %1458 = vtanh.f32 %v887_v36  ;;  %v2913_v35 = vld [vmem:[#allocation20_spill] sm:$0xff]  ;;  %v2914_v36 = vld [vmem:[#allocation41_spill] sm:$0xff] }
 0x2d3   :  { %v894_v33 = vmul.f32 0.5, %v1455_v56  ;;  %v2915_v56 = vld [vmem:[#allocation42_spill] sm:$0xff] }
 0x2d4   :  { %v893_v0 = vadd.f32 0.5, %v892_v34  ;;  %v2912_v34 = vld [vmem:[#allocation19_spill] sm:$0xff] }
 0x2d5   :  { %v895_v59 = vadd.f32 0.5, %v894_v33  ;;  %v2911_v33 = vld [vmem:[#allocation18_spill] sm:$0xff] }
 0x2d6   :  { %v1457_v63 = vpop.eup %1456 }
 0x2d7   :  { %v898_v43 = vmul.f32 %v895_v59, %v2325_v60  ;;  %v899_v42 = vmul.f32 %v1457_v63, %v893_v0  ;;  %v2910_v60 = vld [vmem:[#allocation17_spill] sm:$0xff]  ;;  %v2919_v0 = vld [vmem:[#allocation22_spill] sm:$0xff]  ;;  %v2920_v59 = vld [vmem:[#allocation23_spill] sm:$0xff] }
 0x2d8   :  { %v1459_v48 = vpop.eup %1458  ;;  %v2921_v63 = vld [vmem:[#allocation24_spill] sm:$0xff] }
 0x2d9   :  { %v2525_v13 = vadd.f32 %v899_v42, %v898_v43  ;;  %v896_v40 = vmul.f32 0.5, %v1459_v48  ;;  %v2922_v43 = vld [vmem:[#allocation25_spill] sm:$0xff]  ;;  %v2923_v42 = vld [vmem:[#allocation26_spill] sm:$0xff]  ;;  %v2924_v48 = vld [vmem:[#allocation27_spill] sm:$0xff] }
 0x2db   :  { %1460 = vtanh.f32 %v2525_v13  ;;  %v897_v37 = vadd.f32 0.5, %v896_v40  ;;  %v2925_v40 = vld [vmem:[#allocation28_spill] sm:$0xff] }
 0x2e1   :  { %v1461_v38 = vpop.eup %1460 }
 0x2e2   :  { %v902_v41 = vmul.f32 %v1461_v38, %v897_v37  ;;  %v2926_v37 = vld [vmem:[#allocation29_spill] sm:$0xff]  ;;  %v2927_v38 = vld [vmem:[#allocation30_spill] sm:$0xff] }
 0x2e4   :  { %926 = vmatmul.f32.vlgmr.msrb.gmra.mxu0 %v902_v41  ;;  %946 = vmatmul.f32.vlgmr.msrb.gmra.mxu1 %v902_v41 }
 0x2e5   :  { %966 = vmatmul.f32.vlgmr.msrb.gmra.mxu2 %v902_v41  ;;  %986 = vmatmul.f32.vlgmr.msrb.gmra.mxu3 %v902_v41  ;;  %v2928_v41 = vld [vmem:[#allocation31_spill] sm:$0xff] }
 0x2e6   :  { %1130 = vmatpush.msrb.mxu0 %v2328_v62  ;;  %1150 = vmatpush.msrb.mxu1 %v2331_v52 }
 0x2e7   :  { %1170 = vmatpush.msrb.mxu2 %v2334_v46  ;;  %1190 = vmatpush.msrb.mxu3 %v2337_v45 }
 0x2e8   :  { %1131 = vmatpush.msrb.mxu0 %v2340_v58  ;;  %1151 = vmatpush.msrb.mxu1 %v2343_v54 }
 0x2e9   :  { %1171 = vmatpush.msrb.mxu2 %v2346_v61  ;;  %1191 = vmatpush.msrb.mxu3 %v2349_v50 }
 0x2ea   :  { %1132 = vmatpush.msrb.mxu0 %v2352_v39  ;;  %1152 = vmatpush.msrb.mxu1 %v2355_v44 }
 0x2eb   :  { %1172 = vmatpush.msrb.mxu2 %v2358_v55  ;;  %1192 = vmatpush.msrb.mxu3 %v2361_v26 }
 0x2ec   :  { %1133 = vmatpush.msrb.mxu0 %v2364_v57  ;;  %1153 = vmatpush.msrb.mxu1 %v2367_v53 }
 0x2ed   :  { %1173 = vmatpush.msrb.mxu2 %v2370_v1  ;;  %1193 = vmatpush.msrb.mxu3 %v2373_v2 }
 0x2ee   :  { %1134 = vmatpush.msrb.mxu0 %v2376_v3  ;;  %1154 = vmatpush.msrb.mxu1 %v2379_v4 }
 0x2ef   :  { %1174 = vmatpush.msrb.mxu2 %v2382_v5  ;;  %1194 = vmatpush.msrb.mxu3 %v2385_v6 }
 0x2f0   :  { %1135 = vmatpush.msrb.mxu0 %v2388_v7  ;;  %1155 = vmatpush.msrb.mxu1 %v2391_v8 }
 0x2f1   :  { %1175 = vmatpush.msrb.mxu2 %v2394_v9  ;;  %1195 = vmatpush.msrb.mxu3 %v2397_v10 }
 0x2f2   :  { %1136 = vmatpush.msrb.mxu0 %v2400_v11  ;;  %1156 = vmatpush.msrb.mxu1 %v2403_v12 }
 0x2f3   :  { %1176 = vmatpush.msrb.mxu2 %v2406_v14  ;;  %1196 = vmatpush.msrb.mxu3 %v2409_v15 }
 0x2f4   :  { %1137 = vmatpush.msrb.mxu0 %v2412_v16  ;;  %1157 = vmatpush.msrb.mxu1 %v2415_v17 }
 0x2f5   :  { %1177 = vmatpush.msrb.mxu2 %v2418_v18  ;;  %1197 = vmatpush.msrb.mxu3 %v2421_v19 }
 0x2f6   :  { %1138 = vmatpush.msrb.mxu0 %v2424_v20  ;;  %1158 = vmatpush.msrb.mxu1 %v2427_v21 }
 0x2f7   :  { %1178 = vmatpush.msrb.mxu2 %v2430_v22  ;;  %1198 = vmatpush.msrb.mxu3 %v2433_v23 }
 0x2f8   :  { %1139 = vmatpush.msrb.mxu0 %v2436_v24  ;;  %1159 = vmatpush.msrb.mxu1 %v2439_v25 }
 0x2f9   :  { %1179 = vmatpush.msrb.mxu2 %v2442_v27  ;;  %1199 = vmatpush.msrb.mxu3 %v2445_v28 }
 0x2fa   :  { %1140 = vmatpush.msrb.mxu0 %v2448_v29  ;;  %1160 = vmatpush.msrb.mxu1 %v2451_v30 }
 0x2fb   :  { %1180 = vmatpush.msrb.mxu2 %v2454_v31  ;;  %1200 = vmatpush.msrb.mxu3 %v2457_v32 }
 0x2fc   :  { %1141 = vmatpush.msrb.mxu0 %v2910_v60  ;;  %1161 = vmatpush.msrb.mxu1 %v2911_v33 }
 0x2fd   :  { %1181 = vmatpush.msrb.mxu2 %v2912_v34  ;;  %1201 = vmatpush.msrb.mxu3 %v2913_v35  ;;  %v2933_v35 = vld [vmem:[#allocation56_spill] sm:$0xff] }
 0x2fe   :  { %1142 = vmatpush.msrb.mxu0 %v2914_v36  ;;  %1162 = vmatpush.msrb.mxu1 %v2915_v56  ;;  %v2932_v36 = vld [vmem:[#allocation55_spill] sm:$0xff] }
 0x2ff   :  { %1182 = vmatpush.msrb.mxu2 %v2916_v49  ;;  %1202 = vmatpush.msrb.mxu3 %v2917_v47  ;;  %v2930_v47 = vld [vmem:[#allocation53_spill] sm:$0xff]  ;;  %v2931_v49 = vld [vmem:[#allocation54_spill] sm:$0xff] }
 0x300   :  { %1143 = vmatpush.msrb.mxu0 %v2918_v51  ;;  %1163 = vmatpush.msrb.mxu1 %v2919_v0  ;;  %v2929_v51 = vld [vmem:[#allocation32_spill] sm:$0xff] }
 0x301   :  { %1183 = vmatpush.msrb.mxu2 %v2920_v59  ;;  %1203 = vmatpush.msrb.mxu3 %v2921_v63 }
 0x302   :  { %1144 = vmatpush.msrb.mxu0 %v2922_v43  ;;  %1164 = vmatpush.msrb.mxu1 %v2923_v42 }
 0x303   :  { %1184 = vmatpush.msrb.mxu2 %v2924_v48  ;;  %1204 = vmatpush.msrb.mxu3 %v2925_v40 }
 0x304   :  { %1145 = vmatpush.msrb.mxu0 %v2926_v37  ;;  %1165 = vmatpush.msrb.mxu1 %v2927_v38 }
 0x305   :  { %1185 = vmatpush.msrb.mxu2 %v2928_v41  ;;  %1205 = vmatpush.msrb.mxu3 %v2929_v51 }
 0x361   :  { %v927_v0 = vpop.f32.mrf.mxu0  ;;  %v947_v59 = vpop.f32.mrf.mxu1 }
 0x362   :  { %v990_v63 = vadd.f32 %v927_v0, %v2930_v47  ;;  %v991_v43 = vadd.f32 %v947_v59, %v2931_v49 }
 0x364   :  { %v994_v56 = vmul.f32 0.5, %v990_v63  ;;  %v995_v42 = vmul.f32 0.5, %v991_v43 }
 0x366   :  { %1462 = vtanh.f32 %v994_v56 }
 0x367   :  { %1464 = vtanh.f32 %v995_v42 }
 0x368   :  { %v967_v48 = vpop.f32.mrf.mxu2  ;;  %v987_v40 = vpop.f32.mrf.mxu3 }
 0x369   :  { %v992_v37 = vadd.f32 %v967_v48, %v2932_v36  ;;  %v993_v38 = vadd.f32 %v987_v40, %v2933_v35 }
 0x36b   :  { %1466 = vtanh.f32 %v992_v37  ;;  %v997_v41 = vmul.f32 0.5, %v993_v38  ;;  %v1358_v37 = vld [vmem:[#allocation11 + $0x78] sm:$0xff] }
 0x36c   :  { %v1463_v34 = vpop.eup %1462 }
 0x36d   :  { %v1465_v51 = vpop.eup %1464  ;;  %v1002_v33 = vmul.f32 0.5, %v1463_v34  ;;  %1468 = vtanh.f32 %v997_v41 }
 0x36e   :  { %v1004_v60 = vmul.f32 0.5, %v1465_v51 }
 0x36f   :  { %v1003_v47 = vadd.f32 0.5, %v1002_v33 }
 0x370   :  { %v1005_v0 = vadd.f32 0.5, %v1004_v60 }
 0x371   :  { %v1467_v49 = vpop.eup %1466 }
 0x372   :  { %v1008_v59 = vmul.f32 %v1005_v0, %v2525_v13  ;;  %v1009_v56 = vmul.f32 %v1467_v49, %v1003_v47  ;;  %v2958_v47 = vld [vmem:[#allocation61_spill] sm:$0xff]  ;;  %v2959_v49 = vld [vmem:[#allocation62_spill] sm:$0xff] }
 0x373   :  { %v1469_v63 = vpop.eup %1468 }
 0x374   :  { %v2597_v43 = vadd.f32 %v1009_v56, %v1008_v59  ;;  %v1006_v36 = vmul.f32 0.5, %v1469_v63 }
 0x376   :  { %1470 = vtanh.f32 %v2597_v43  ;;  %v1007_v35 = vadd.f32 0.5, %v1006_v36 }
 0x37c   :  { %v1471_v42 = vpop.eup %1470 }
 0x37d   :  { %v1012_v48 = vmul.f32 %v1471_v42, %v1007_v35  ;;  %v2960_v35 = vld [vmem:[#allocation63_spill] sm:$0xff] }
 0x37f   :  { %1036 = vmatmul.f32.vlgmr.msra.gmra.mxu0 %v1012_v48  ;;  %1056 = vmatmul.f32.vlgmr.msra.gmra.mxu1 %v1012_v48 }
 0x380   :  { %1076 = vmatmul.f32.vlgmr.msra.gmra.mxu2 %v1012_v48  ;;  %1096 = vmatmul.f32.vlgmr.msra.gmra.mxu3 %v1012_v48  ;;  %v2961_v48 = vld [vmem:[#allocation64_spill] sm:$0xff] }
 0x381   :  { %1240 = vmatpush.msra.mxu0 %v2328_v62  ;;  %1260 = vmatpush.msra.mxu1 %v2331_v52  ;;  %v2934_v62 = vld [vmem:[#allocation17_spill] sm:$0xff]  ;;  %v2935_v52 = vld [vmem:[#allocation18_spill] sm:$0xff] }
 0x382   :  { %1280 = vmatpush.msra.mxu2 %v2334_v46  ;;  %1300 = vmatpush.msra.mxu3 %v2337_v45  ;;  %v2936_v46 = vld [vmem:[#allocation19_spill] sm:$0xff]  ;;  %v2937_v45 = vld [vmem:[#allocation20_spill] sm:$0xff] }
 0x383   :  { %1241 = vmatpush.msra.mxu0 %v2340_v58  ;;  %1261 = vmatpush.msra.mxu1 %v2343_v54  ;;  %v2938_v58 = vld [vmem:[#allocation41_spill] sm:$0xff]  ;;  %v2939_v54 = vld [vmem:[#allocation42_spill] sm:$0xff] }
 0x384   :  { %1281 = vmatpush.msra.mxu2 %v2346_v61  ;;  %1301 = vmatpush.msra.mxu3 %v2349_v50  ;;  %v2940_v61 = vld [vmem:[#allocation43_spill] sm:$0xff]  ;;  %v2941_v50 = vld [vmem:[#allocation44_spill] sm:$0xff] }
 0x385   :  { %1242 = vmatpush.msra.mxu0 %v2352_v39  ;;  %1262 = vmatpush.msra.mxu1 %v2355_v44  ;;  %v2942_v39 = vld [vmem:[#allocation21_spill] sm:$0xff]  ;;  %v2943_v44 = vld [vmem:[#allocation22_spill] sm:$0xff] }
 0x386   :  { %1282 = vmatpush.msra.mxu2 %v2358_v55  ;;  %1302 = vmatpush.msra.mxu3 %v2361_v26  ;;  %v2944_v55 = vld [vmem:[#allocation23_spill] sm:$0xff]  ;;  %v2945_v26 = vld [vmem:[#allocation24_spill] sm:$0xff] }
 0x387   :  { %1243 = vmatpush.msra.mxu0 %v2364_v57  ;;  %1263 = vmatpush.msra.mxu1 %v2367_v53  ;;  %v2946_v57 = vld [vmem:[#allocation25_spill] sm:$0xff]  ;;  %v2947_v53 = vld [vmem:[#allocation26_spill] sm:$0xff] }
 0x388   :  { %1283 = vmatpush.msra.mxu2 %v2370_v1  ;;  %1303 = vmatpush.msra.mxu3 %v2373_v2  ;;  %v2948_v1 = vld [vmem:[#allocation27_spill] sm:$0xff]  ;;  %v2949_v2 = vld [vmem:[#allocation28_spill] sm:$0xff] }
 0x389   :  { %1244 = vmatpush.msra.mxu0 %v2376_v3  ;;  %1264 = vmatpush.msra.mxu1 %v2379_v4  ;;  %v2950_v3 = vld [vmem:[#allocation29_spill] sm:$0xff]  ;;  %v2951_v4 = vld [vmem:[#allocation30_spill] sm:$0xff] }
 0x38a   :  { %1284 = vmatpush.msra.mxu2 %v2382_v5  ;;  %1304 = vmatpush.msra.mxu3 %v2385_v6  ;;  %v2952_v5 = vld [vmem:[#allocation31_spill] sm:$0xff]  ;;  %v2953_v6 = vld [vmem:[#allocation32_spill] sm:$0xff] }
 0x38b   :  { %1245 = vmatpush.msra.mxu0 %v2388_v7  ;;  %1265 = vmatpush.msra.mxu1 %v2391_v8 }
 0x38c   :  { %1285 = vmatpush.msra.mxu2 %v2394_v9  ;;  %1305 = vmatpush.msra.mxu3 %v2397_v10  ;;  %v2954_v9 = vld [vmem:[#allocation57_spill] sm:$0xff] }
 0x38d   :  { %1246 = vmatpush.msra.mxu0 %v2400_v11  ;;  %1266 = vmatpush.msra.mxu1 %v2403_v12  ;;  %v2955_v11 = vld [vmem:[#allocation58_spill] sm:$0xff] }
 0x38e   :  { %1286 = vmatpush.msra.mxu2 %v2406_v14  ;;  %1306 = vmatpush.msra.mxu3 %v2409_v15 }
 0x38f   :  { %1247 = vmatpush.msra.mxu0 %v2412_v16  ;;  %1267 = vmatpush.msra.mxu1 %v2415_v17 }
 0x390   :  { %1287 = vmatpush.msra.mxu2 %v2418_v18  ;;  %1307 = vmatpush.msra.mxu3 %v2421_v19  ;;  %v2956_v18 = vld [vmem:[#allocation59_spill] sm:$0xff] }
 0x391   :  { %1248 = vmatpush.msra.mxu0 %v2424_v20  ;;  %1268 = vmatpush.msra.mxu1 %v2427_v21  ;;  %v2957_v20 = vld [vmem:[#allocation60_spill] sm:$0xff] }
 0x392   :  { %1288 = vmatpush.msra.mxu2 %v2430_v22  ;;  %1308 = vmatpush.msra.mxu3 %v2433_v23 }
 0x393   :  { %1249 = vmatpush.msra.mxu0 %v2436_v24  ;;  %1269 = vmatpush.msra.mxu1 %v2439_v25 }
 0x394   :  { %1289 = vmatpush.msra.mxu2 %v2442_v27  ;;  %1309 = vmatpush.msra.mxu3 %v2445_v28 }
 0x395   :  { %1250 = vmatpush.msra.mxu0 %v2448_v29  ;;  %1270 = vmatpush.msra.mxu1 %v2451_v30 }
 0x396   :  { %1290 = vmatpush.msra.mxu2 %v2454_v31  ;;  %1310 = vmatpush.msra.mxu3 %v2457_v32 }
 0x397   :  { %1251 = vmatpush.msra.mxu0 %v2934_v62  ;;  %1271 = vmatpush.msra.mxu1 %v2935_v52 }
 0x398   :  { %1291 = vmatpush.msra.mxu2 %v2936_v46  ;;  %1311 = vmatpush.msra.mxu3 %v2937_v45 }
 0x399   :  { %1252 = vmatpush.msra.mxu0 %v2938_v58  ;;  %1272 = vmatpush.msra.mxu1 %v2939_v54 }
 0x39a   :  { %1292 = vmatpush.msra.mxu2 %v2940_v61  ;;  %1312 = vmatpush.msra.mxu3 %v2941_v50 }
 0x39b   :  { %1253 = vmatpush.msra.mxu0 %v2942_v39  ;;  %1273 = vmatpush.msra.mxu1 %v2943_v44 }
 0x39c   :  { %1293 = vmatpush.msra.mxu2 %v2944_v55  ;;  %1313 = vmatpush.msra.mxu3 %v2945_v26 }
 0x39d   :  { %1254 = vmatpush.msra.mxu0 %v2946_v57  ;;  %1274 = vmatpush.msra.mxu1 %v2947_v53 }
 0x39e   :  { %1294 = vmatpush.msra.mxu2 %v2948_v1  ;;  %1314 = vmatpush.msra.mxu3 %v2949_v2 }
 0x39f   :  { %1255 = vmatpush.msra.mxu0 %v2950_v3  ;;  %1275 = vmatpush.msra.mxu1 %v2951_v4  ;;  %v1357_v4 = vld [vmem:[#allocation11 + $0x70] sm:$0xff] }
 0x3a0   :  { %1295 = vmatpush.msra.mxu2 %v2952_v5  ;;  %1315 = vmatpush.msra.mxu3 %v2953_v6  ;;  %v1356_v5 = vld [vmem:[#allocation11 + $0x68] sm:$0xff]  ;;  %v1355_v6 = vld [vmem:[#allocation11 + $0x60] sm:$0xff] }
 0x3fc   :  { %v1037_v7 = vpop.f32.mrf.mxu0  ;;  %v1057_v8 = vpop.f32.mrf.mxu1 }
 0x3fd   :  { %v1100_v10 = vadd.f32 %v1037_v7, %v2954_v9  ;;  %v1101_v12 = vadd.f32 %v1057_v8, %v2955_v11  ;;  %v1354_v7 = vld [vmem:[#allocation11 + $0x58] sm:$0xff]  ;;  %v1353_v8 = vld [vmem:[#allocation11 + $0x50] sm:$0xff]  ;;  %v1352_v9 = vld [vmem:[#allocation11 + $0x48] sm:$0xff] }
 0x3fe   :  { %v1350_v11 = vld [vmem:[#allocation11 + $0x38] sm:$0xff] }
 0x3ff   :  { %v1104_v14 = vmul.f32 0.5, %v1100_v10  ;;  %v1105_v15 = vmul.f32 0.5, %v1101_v12  ;;  %v1351_v10 = vld [vmem:[#allocation11 + $0x40] sm:$0xff]  ;;  %v1349_v12 = vld [vmem:[#allocation11 + $0x30] sm:$0xff] }
 0x401   :  { %1472 = vtanh.f32 %v1104_v14  ;;  %v1348_v14 = vld [vmem:[#allocation11 + $0x28] sm:$0xff] }
 0x402   :  { %1474 = vtanh.f32 %v1105_v15  ;;  %v1347_v15 = vld [vmem:[#allocation11 + $0x20] sm:$0xff] }
 0x403   :  { %v1077_v16 = vpop.f32.mrf.mxu2  ;;  %v1097_v17 = vpop.f32.mrf.mxu3 }
 0x404   :  { %v1102_v19 = vadd.f32 %v1077_v16, %v2956_v18  ;;  %v1103_v21 = vadd.f32 %v1097_v17, %v2957_v20  ;;  %v1346_v16 = vld [vmem:[#allocation11 + $0x18] sm:$0xff]  ;;  %v1345_v17 = vld [vmem:[#allocation11 + $0x10] sm:$0xff]  ;;  %v1344_v18 = vld [vmem:[#allocation11 + $0x8] sm:$0xff] }
 0x406   :  { %1476 = vtanh.f32 %v1102_v19  ;;  %v1107_v22 = vmul.f32 0.5, %v1103_v21  ;;  %v1343_v19 = vld [vmem:[#allocation11] sm:$0xff] }
 0x407   :  { %v1473_v23 = vpop.eup %1472 }
 0x408   :  { %v1475_v24 = vpop.eup %1474  ;;  %v1112_v25 = vmul.f32 0.5, %v1473_v23  ;;  %1478 = vtanh.f32 %v1107_v22  ;;  %v2962_v22 = vld [vmem:[#allocation65_spill] sm:$0xff] }
 0x409   :  { %v1114_v27 = vmul.f32 0.5, %v1475_v24  ;;  %v2963_v24 = vld [vmem:[#allocation66_spill] sm:$0xff] }
 0x40a   :  { %v1113_v28 = vadd.f32 0.5, %v1112_v25 }
 0x40b   :  { %v1115_v29 = vadd.f32 0.5, %v1114_v27 }
 0x40c   :  { %v1477_v30 = vpop.eup %1476 }
 0x40d   :  { %v1118_v31 = vmul.f32 %v1115_v29, %v2597_v43  ;;  %v1119_v32 = vmul.f32 %v1477_v30, %v1113_v28 }
 0x40e   :  { %v1479_v13 = vpop.eup %1478 }
 0x40f   :  { %v1120_v60 = vadd.f32 %v1119_v32, %v1118_v31  ;;  %v1116_v33 = vmul.f32 0.5, %v1479_v13  ;;  %v2964_v31 = vld [vmem:[#allocation67_spill] sm:$0xff]  ;;  %v2965_v13 = vld [vmem:[#allocation68_spill] sm:$0xff] }
 0x411   :  { %1480 = vtanh.f32 %v1120_v60  ;;  %v1117_v34 = vadd.f32 0.5, %v1116_v33 }
 0x417   :  { %v1481_v51 = vpop.eup %1480 }
 0x418   :  { %v1122_v40 = vmul.f32 %v1481_v51, %v1117_v34 }
 0x41a   :  { %1146 = vmatmul.f32.vlgmr.msrb.gmra.mxu0 %v1122_v40  ;;  %1166 = vmatmul.f32.vlgmr.msrb.gmra.mxu1 %v1122_v40 }
 0x41b   :  { %1186 = vmatmul.f32.vlgmr.msrb.gmra.mxu2 %v1122_v40  ;;  %1206 = vmatmul.f32.vlgmr.msrb.gmra.mxu3 %v1122_v40 }
 0x41c   :  { %1363 = vmatpush.msrb.mxu0 %v1358_v37 }
 0x41e   :  { %1364 = vmatpush.msrb.mxu0 %v1357_v4 }
 0x420   :  { %1365 = vmatpush.msrb.mxu0 %v1356_v5 }
 0x422   :  { %1366 = vmatpush.msrb.mxu0 %v1355_v6 }
 0x424   :  { %1367 = vmatpush.msrb.mxu0 %v1354_v7 }
 0x426   :  { %1368 = vmatpush.msrb.mxu0 %v1353_v8 }
 0x428   :  { %1369 = vmatpush.msrb.mxu0 %v1352_v9 }
 0x42a   :  { %1370 = vmatpush.msrb.mxu0 %v1351_v10 }
 0x42c   :  { %1371 = vmatpush.msrb.mxu0 %v1350_v11 }
 0x42e   :  { %1372 = vmatpush.msrb.mxu0 %v1349_v12 }
 0x430   :  { %1373 = vmatpush.msrb.mxu0 %v1348_v14 }
 0x432   :  { %1374 = vmatpush.msrb.mxu0 %v1347_v15 }
 0x434   :  { %1375 = vmatpush.msrb.mxu0 %v1346_v16 }
 0x436   :  { %1376 = vmatpush.msrb.mxu0 %v1345_v17 }
 0x438   :  { %1377 = vmatpush.msrb.mxu0 %v1344_v18 }
 0x43a   :  { %1378 = vmatpush.msrb.mxu0 %v1343_v19 }
 0x497   :  { %v1147_v38 = vpop.f32.mrf.mxu0  ;;  %v1167_v41 = vpop.f32.mrf.mxu1 }
 0x498   :  { %v1210_v0 = vadd.f32 %v1147_v38, %v2958_v47  ;;  %v1211_v59 = vadd.f32 %v1167_v41, %v2959_v49 }
 0x49a   :  { %v1214_v56 = vmul.f32 0.5, %v1210_v0  ;;  %v1215_v63 = vmul.f32 0.5, %v1211_v59 }
 0x49c   :  { %1482 = vtanh.f32 %v1214_v56 }
 0x49d   :  { %1484 = vtanh.f32 %v1215_v63 }
 0x49e   :  { %v1187_v43 = vpop.f32.mrf.mxu2  ;;  %v1207_v36 = vpop.f32.mrf.mxu3 }
 0x49f   :  { %v1212_v42 = vadd.f32 %v1187_v43, %v2960_v35  ;;  %v1213_v62 = vadd.f32 %v1207_v36, %v2961_v48 }
 0x4a1   :  { %1486 = vtanh.f32 %v1212_v42  ;;  %v1217_v52 = vmul.f32 0.5, %v1213_v62  ;;  %v1421_v42 = vld [vmem:[%s2688_s5] ss:$0 sm:$0xff] }
 0x4a2   :  { %v1483_v46 = vpop.eup %1482 }
 0x4a3   :  { %v1485_v45 = vpop.eup %1484  ;;  %v1222_v58 = vmul.f32 0.5, %v1483_v46  ;;  %1488 = vtanh.f32 %v1217_v52 }
 0x4a4   :  { %v1224_v54 = vmul.f32 0.5, %v1485_v45 }
 0x4a5   :  { %v1223_v61 = vadd.f32 0.5, %v1222_v58 }
 0x4a6   :  { %v1225_v50 = vadd.f32 0.5, %v1224_v54 }
 0x4a7   :  { %v1487_v39 = vpop.eup %1486 }
 0x4a8   :  { %v1228_v44 = vmul.f32 %v1225_v50, %v1120_v60  ;;  %v1229_v55 = vmul.f32 %v1487_v39, %v1223_v61 }
 0x4a9   :  { %v1489_v26 = vpop.eup %1488 }
 0x4aa   :  { %v1230_v57 = vadd.f32 %v1229_v55, %v1228_v44  ;;  %v1226_v53 = vmul.f32 0.5, %v1489_v26 }
 0x4ac   :  { %1490 = vtanh.f32 %v1230_v57  ;;  %v1227_v1 = vadd.f32 0.5, %v1226_v53 }
 0x4b2   :  { %v1491_v2 = vpop.eup %1490 }
 0x4b3   :  { %v1232_v3 = vmul.f32 %v1491_v2, %v1227_v1 }
 0x4b5   :  { %1256 = vmatmul.f32.vlgmr.msra.gmra.mxu0 %v1232_v3  ;;  %1276 = vmatmul.f32.vlgmr.msra.gmra.mxu1 %v1232_v3 }
 0x4b6   :  { %1296 = vmatmul.f32.vlgmr.msra.gmra.mxu2 %v1232_v3  ;;  %1316 = vmatmul.f32.vlgmr.msra.gmra.mxu3 %v1232_v3 }
 0x532   :  { %v1257_v20 = vpop.f32.mrf.mxu0  ;;  %v1277_v21 = vpop.f32.mrf.mxu1 }
 0x533   :  { %v1320_v23 = vadd.f32 %v1257_v20, %v2962_v22  ;;  %v1321_v25 = vadd.f32 %v1277_v21, %v2963_v24 }
 0x535   :  { %v1324_v27 = vmul.f32 0.5, %v1320_v23  ;;  %v1325_v28 = vmul.f32 0.5, %v1321_v25 }
 0x537   :  { %1492 = vtanh.f32 %v1324_v27 }
 0x538   :  { %1494 = vtanh.f32 %v1325_v28 }
 0x539   :  { %v1297_v29 = vpop.f32.mrf.mxu2  ;;  %v1317_v30 = vpop.f32.mrf.mxu3 }
 0x53a   :  { %v1322_v32 = vadd.f32 %v1297_v29, %v2964_v31  ;;  %v1323_v60 = vadd.f32 %v1317_v30, %v2965_v13 }
 0x53c   :  { %1496 = vtanh.f32 %v1322_v32  ;;  %v1327_v33 = vmul.f32 0.5, %v1323_v60 }
 0x53d   :  { %v1493_v34 = vpop.eup %1492 }
 0x53e   :  { %v1495_v51 = vpop.eup %1494  ;;  %v1332_v40 = vmul.f32 0.5, %v1493_v34  ;;  %1498 = vtanh.f32 %v1327_v33 }
 0x53f   :  { %v1334_v37 = vmul.f32 0.5, %v1495_v51 }
 0x540   :  { %v1333_v38 = vadd.f32 0.5, %v1332_v40 }
 0x541   :  { %v1335_v41 = vadd.f32 0.5, %v1334_v37 }
 0x542   :  { %v1497_v47 = vpop.eup %1496 }
 0x543   :  { %v1338_v0 = vmul.f32 %v1335_v41, %v1230_v57  ;;  %v1339_v49 = vmul.f32 %v1497_v47, %v1333_v38 }
 0x544   :  { %v1499_v59 = vpop.eup %1498 }
 0x545   :  { %v1340_v56 = vadd.f32 %v1339_v49, %v1338_v0  ;;  %v1336_v63 = vmul.f32 0.5, %v1499_v59 }
 0x547   :  { %1500 = vtanh.f32 %v1340_v56  ;;  %v1337_v43 = vadd.f32 0.5, %v1336_v63 }
 0x54d   :  { %v1501_v36 = vpop.eup %1500 }
 0x54e   :  { %v1342_v35 = vmul.f32 %v1501_v36, %v1337_v43 }
 0x550   :  { %1379 = vmatmul.f32.vlgmr.msrb.gmra.mxu0 %v1342_v35 }
 0x5cd   :  { %v1380_v48 = vpop.f32.mrf.mxu0 }
 0x5ce   :  { %v1381_v62 = vadd.f32 %v1421_v42, %v1380_v48 }
 0x5d0   :  { %1383 = vst [vmem:[#allocation12] sm:$0xff] %v1381_v62 }
 0x5d1   :  { %1394 = dma.vmem_to_hbm [thread:$0]  %s1390_s24, 128, %s1392_s27, [#allocation5]  }
 0x5d2   :  { %1716 = dma.done.wait [#allocation5], 128  }
 0x5d3   :  { %1717 = vsyncadd [#allocation5], 4294967168 }
 0x5d4   :  { %1399 = vsyncpa [#allocation4], 1 }
 0x5d5   :  { %1400 = vsyncpa [#allocation7], 1 }
 0x5d6   :  { %1401 = vsyncpa [#allocation10], 1 }
 0x5d7   :  { %1402 = vsyncpa [#allocation5], 1 }

</bundles_post_ra>
